<compile_context>
chip_gen: v5e
topology: v5e:2x2
jax: 0.10.0
libtpu: 0.0.40
codegen_flags: <defaults>
</compile_context>

<pallas_src>
import functools

import jax
import jax.numpy as jnp
from jax.experimental import pallas as pl
from jax.experimental.pallas import tpu as pltpu

BN_EPS = 1e-5   # torch.nn.BatchNorm1d default


# ----------------------------------------------------------------------------
# Fused per-branch kernel: avg-pool + folded BN + compact per-group classifiers.
# ----------------------------------------------------------------------------
def _final_layer_kernel(x_ref, scale_ref, shift_ref, w_ref,
                        emb_ref, ff_ref, pred_ref, *,
                        inv_n, n_cls, g, n_classes):
    # x_ref    : (1, B, N, C)            branch feature map, channels-last, N=H*W
    # scale_ref: (1, 1, C)               folded BN scale (groups concatenated)
    # shift_ref: (1, 1, C)               folded BN shift
    # w_ref    : (1, n_cls, g, n_classes) compact stacked classifier weights
    # emb_ref  : (1, B, C)               pooled embedding (pre-BN) -> aux_embs
    # ff_ref   : (1, B, C)               BN'd embedding            -> embeddings
    # pred_ref : (1, B, n_cls*n_classes) logits
    x = x_ref[0]                                    # (B, N, C)
    emb = jnp.sum(x, axis=1) * inv_n                # global average pool (B, C)
    ff = emb * scale_ref[0] + shift_ref[0]          # eval-mode BatchNorm1d
    emb_ref[0] = emb
    ff_ref[0] = ff

    w_dtype = w_ref.dtype

    def write_preds(par):
        # Group j owns a classifier iff (branch + j) % 2 == 0, i.e. the
        # classification groups of this branch are j = par, par+2, ...
        chunks = []
        for e in range(n_cls):
            j = 2 * e + par
            ff_g = ff[:, j * g:(j + 1) * g].astype(w_dtype)
            chunks.append(jnp.dot(ff_g, w_ref[0, e],
                                  preferred_element_type=jnp.float32))
        pred_ref[0] = jnp.concatenate(chunks, axis=-1)   # single lane-dense store

    parity = pl.program_id(0) % 2

    @pl.when(parity == 0)
    def _():
        write_preds(0)

    @pl.when(parity == 1)
    def _():
        write_preds(1)


# ----------------------------------------------------------------------------
# Static parameter packing — call ONCE at init, not per forward.
# ----------------------------------------------------------------------------
def _fold_bn(bn):
    gamma, beta, mean, var = bn
    scale = gamma * jax.lax.rsqrt(var + BN_EPS)
    return scale, beta - mean * scale


def pack_final_layer_params(blocks, n_branch, n_groups, n_classes,
                            weight_dtype=jnp.float32):
    """Fold every per-group BatchNorm into (scale, shift) over the full C lanes
    and stack the per-group classifier weights compactly per branch."""
    assert n_groups % 2 == 0, "fused path needs an even n_groups"
    g = blocks[0]["bn"][0].shape[0]
    n_cls = n_groups // 2
    scales, shifts, weights = [], [], []
    for i in range(n_branch):
        sc, sh, ws = [], [], []
        for j in range(n_groups):
            blk = blocks[i + j]
            s, t = _fold_bn(blk["bn"])
            sc.append(s)
            sh.append(t)
            if (i + j) % 2 == 0:                      # ClassificationBlock group
                ws.append(blk["cls_w"].T.astype(weight_dtype))   # (g, n_classes)
        scales.append(jnp.concatenate(sc))
        shifts.append(jnp.concatenate(sh))
        weights.append(jnp.stack(ws))                 # (n_cls, g, n_classes)
    return {
        "scale": jnp.stack(scales)[:, None, :],       # (nb, 1, C)
        "shift": jnp.stack(shifts)[:, None, :],       # (nb, 1, C)
        "cls_w": jnp.stack(weights),                  # (nb, n_cls, g, n_classes)
        "g": g, "n_cls": n_cls, "n_classes": n_classes,
        "n_groups": n_groups, "n_branch": n_branch,
    }


# ----------------------------------------------------------------------------
# Forward: one pallas_call + list scatter (pure layout work).
# ----------------------------------------------------------------------------
def final_layer_forward(xs, packed, cam=None, view=None):
    """Pallas forward of FinalLayer (LBS losses, default block config).

    xs     : list of channels-last branch maps (B, H, W, C) or (B, HW, C),
             or a single pre-stacked (n_branch, B, HW, C) array.
    packed : output of pack_final_layer_params (computed once at init).
    Returns (preds, aux_embs, embeddings) like the PyTorch module; cam/view
    are unused by the reference forward and ignored here too.
    """
    n_branch = packed["n_branch"]
    n_groups = packed["n_groups"]
    g, n_cls, n_classes = packed["g"], packed["n_cls"], packed["n_classes"]
    C = n_groups * g
    P = n_cls * n_classes

    if isinstance(xs, (list, tuple)):
        # channels-last -> (B, HW, C) is a free metadata reshape; one stack.
        x_stk = jnp.stack([x.reshape(x.shape[0], -1, C) for x in xs])
    else:
        x_stk = xs                                    # already (nb, B, N, C)
    nb, B, N, _ = x_stk.shape
    assert nb == n_branch

    kernel = functools.partial(_final_layer_kernel, inv_n=1.0 / N,
                               n_cls=n_cls, g=g, n_classes=n_classes)
    embs, ffs, preds_all = pl.pallas_call(
        kernel,
        out_shape=(
            jax.ShapeDtypeStruct((n_branch, B, C), jnp.float32),
            jax.ShapeDtypeStruct((n_branch, B, C), jnp.float32),
            jax.ShapeDtypeStruct((n_branch, B, P), jnp.float32),
        ),
        grid=(n_branch,),
        in_specs=[
            pl.BlockSpec((1, B, N, C), lambda i: (i, 0, 0, 0)),
            pl.BlockSpec((1, 1, C), lambda i: (i, 0, 0)),
            pl.BlockSpec((1, 1, C), lambda i: (i, 0, 0)),
            pl.BlockSpec((1, n_cls, g, n_classes), lambda i: (i, 0, 0, 0)),
        ],
        out_specs=(
            pl.BlockSpec((1, B, C), lambda i: (i, 0, 0)),
            pl.BlockSpec((1, B, C), lambda i: (i, 0, 0)),
            pl.BlockSpec((1, B, P), lambda i: (i, 0, 0)),
        ),
        compiler_params=pltpu.CompilerParams(
            dimension_semantics=("parallel",)),
    )(x_stk, packed["scale"], packed["shift"], packed["cls_w"])

    # ---- scatter fused outputs back into the module's Python lists ----------
    preds, aux_embs, embeddings = [], [], []
    for i in range(n_branch):
        e = 0
        for j in range(n_groups):
            embeddings.append(ffs[i, :, j * g:(j + 1) * g])
            if (i + j) % 2 == 0:
                preds.append(preds_all[i, :, e * n_classes:(e + 1) * n_classes])
                e += 1
            else:
                aux_embs.append(embs[i, :, j * g:(j + 1) * g])
    return preds, aux_embs, embeddings


# ----------------------------------------------------------------------------
# Pure-JAX reference mirroring the PyTorch forward (eval-mode BN),
# consuming the same channels-last feature maps.
# ----------------------------------------------------------------------------
def reference(xs_cl, blocks, n_groups, n_classes):
    preds, aux_embs, embeddings = [], [], []
    C = xs_cl[0].shape[-1]
    g = C // n_groups
    for i in range(len(xs_cl)):
        emb = jnp.mean(xs_cl[i], axis=(1, 2))                  # (B, C)
        for j in range(n_groups):
            aux = emb[:, g * j:g * (j + 1)]
            blk = blocks[i + j]
            gamma, beta, mean, var = blk["bn"]
            ff = (aux - mean) * jax.lax.rsqrt(var + BN_EPS) * gamma + beta
            if (i + j) % 2 == 0:
                embeddings.append(ff)
                preds.append(ff @ blk["cls_w"].T)
            else:
                aux_embs.append(aux)
                embeddings.append(ff)
    return preds, aux_embs, embeddings


if __name__ == "__main__":
    n_branch = 2                     # len(x) in FinalLayer.forward
    n_groups = 4                     # groups of 2048 / 4 = 512 features
    n_classes = 128
    B, C, H, W = 2, 2048, 8, 8       # module hardcodes 2048 total features
    g = C // n_groups

    key = jax.random.PRNGKey(0)
    keys = jax.random.split(key, n_branch + n_groups * (n_branch + 1))

    # Branch feature maps in the native TPU conv layout (channels-last).
    xs = [jax.random.normal(keys[i], (B, H, W, C), jnp.float32)
          for i in range(n_branch)]

    blocks = []
    for k in range(n_groups * (n_branch + 1)):
        bk = jax.random.split(keys[n_branch + k], 5)
        bn = (1.0 + 0.1 * jax.random.normal(bk[0], (g,), jnp.float32),   # gamma
              0.1 * jax.random.normal(bk[1], (g,), jnp.float32),         # beta
              0.1 * jax.random.normal(bk[2], (g,), jnp.float32),         # r_mean
              jax.random.uniform(bk[3], (g,), jnp.float32, 0.5, 1.5))    # r_var
        blk = {"bn": bn}
        if k % 2 == 0:               # ClassificationBlock -> classifier weight
            blk["cls_w"] = 0.05 * jax.random.normal(
                bk[4], (n_classes, g), jnp.float32)
        blocks.append(blk)

    # Static parameter prep hoisted out of the forward (done once at init).
    packed = pack_final_layer_params(blocks, n_branch, n_groups, n_classes)
    jax.block_until_ready(packed["cls_w"])

    preds, aux_embs, embeddings = final_layer_forward(xs, packed,
                                                      cam=None, view=None)
    jax.block_until_ready(preds + aux_embs + embeddings)

    rp, ra, re = reference(xs, blocks, n_groups, n_classes)
    assert len(preds) == len(rp)
    assert len(aux_embs) == len(ra)
    assert len(embeddings) == len(re)
    for a, b in zip(preds + aux_embs + embeddings, rp + ra + re):
        assert a.shape == b.shape, (a.shape, b.shape)
        assert jnp.allclose(a, b, rtol=1e-3, atol=1e-3), float(
            jnp.max(jnp.abs(a - b)))
    print("KERNEL_OK")
</pallas_src>

<mosaic_0001>
module attributes {stable_mosaic.version = 11 : i64} {
  func.func @_final_layer_kernel(%arg0: i32, %arg1: memref<1x2x64x2048xf32, #tpu.memory_space<vmem>>, %arg2: memref<1x1x2048xf32, #tpu.memory_space<vmem>>, %arg3: memref<1x1x2048xf32, #tpu.memory_space<vmem>>, %arg4: memref<1x2x512x128xf32, #tpu.memory_space<vmem>>, %arg5: memref<1x2x2048xf32, #tpu.memory_space<vmem>>, %arg6: memref<1x2x2048xf32, #tpu.memory_space<vmem>>, %arg7: memref<1x2x256xf32, #tpu.memory_space<vmem>>) attributes {dimension_semantics = [#tpu.dimension_semantics<parallel>], iteration_bounds = array<i64: 2>, scalar_prefetch = 0 : i64, scratch_operands = 0 : i64, tpu.core_type = #tpu.core_type<tc>, window_params = [{transform_indices = @transform_0, window_bounds = array<i64: 1, 2, 64, 2048>}, {transform_indices = @transform_1, window_bounds = array<i64: 1, 1, 2048>}, {transform_indices = @transform_2, window_bounds = array<i64: 1, 1, 2048>}, {transform_indices = @transform_3, window_bounds = array<i64: 1, 2, 512, 128>}, {transform_indices = @transform_4, window_bounds = array<i64: 1, 2, 2048>}, {transform_indices = @transform_5, window_bounds = array<i64: 1, 2, 2048>}, {transform_indices = @transform_6, window_bounds = array<i64: 1, 2, 256>}]} {
    %c0 = arith.constant 0 : index
    %c0_0 = arith.constant 0 : index
    %c0_1 = arith.constant 0 : index
    %c0_2 = arith.constant 0 : index
    %0 = vector.load %arg1[%c0, %c0_0, %c0_1, %c0_2] : memref<1x2x64x2048xf32, #tpu.memory_space<vmem>>, vector<1x2x64x2048xf32>
    %1 = vector.shape_cast %0 : vector<1x2x64x2048xf32> to vector<2x64x2048xf32>
    %cst = arith.constant dense<0.000000e+00> : vector<2x2048xf32>
    %2 = vector.multi_reduction <add>, %1, %cst [1] : vector<2x64x2048xf32> to vector<2x2048xf32>
    %cst_3 = arith.constant 1.562500e-02 : f32
    %3 = vector.broadcast %cst_3 : f32 to vector<2x2048xf32>
    %4 = arith.mulf %2, %3 : vector<2x2048xf32>
    %c0_4 = arith.constant 0 : index
    %c0_5 = arith.constant 0 : index
    %c0_6 = arith.constant 0 : index
    %5 = vector.load %arg2[%c0_4, %c0_5, %c0_6] : memref<1x1x2048xf32, #tpu.memory_space<vmem>>, vector<1x1x2048xf32>
    %6 = vector.shape_cast %5 : vector<1x1x2048xf32> to vector<1x2048xf32>
    %7 = vector.broadcast %6 : vector<1x2048xf32> to vector<2x2048xf32>
    %8 = arith.mulf %4, %7 : vector<2x2048xf32>
    %c0_7 = arith.constant 0 : index
    %c0_8 = arith.constant 0 : index
    %c0_9 = arith.constant 0 : index
    %9 = vector.load %arg3[%c0_7, %c0_8, %c0_9] : memref<1x1x2048xf32, #tpu.memory_space<vmem>>, vector<1x1x2048xf32>
    %10 = vector.shape_cast %9 : vector<1x1x2048xf32> to vector<1x2048xf32>
    %11 = vector.broadcast %10 : vector<1x2048xf32> to vector<2x2048xf32>
    %12 = arith.addf %8, %11 : vector<2x2048xf32>
    %c0_10 = arith.constant 0 : index
    %c0_11 = arith.constant 0 : index
    %c0_12 = arith.constant 0 : index
    %13 = vector.load %arg5[%c0_10, %c0_11, %c0_12] : memref<1x2x2048xf32, #tpu.memory_space<vmem>>, vector<1x2x2048xf32>
    %14 = vector.shape_cast %13 : vector<1x2x2048xf32> to vector<2x2048xf32>
    %15 = vector.shape_cast %4 : vector<2x2048xf32> to vector<1x2x2048xf32>
    tpu.vector_store %arg5[%c0_10, %c0_11, %c0_12], %15 {strides = array<i32>} : memref<1x2x2048xf32, #tpu.memory_space<vmem>>, vector<1x2x2048xf32>,
    %c0_13 = arith.constant 0 : index
    %c0_14 = arith.constant 0 : index
    %c0_15 = arith.constant 0 : index
    %16 = vector.load %arg6[%c0_13, %c0_14, %c0_15] : memref<1x2x2048xf32, #tpu.memory_space<vmem>>, vector<1x2x2048xf32>
    %17 = vector.shape_cast %16 : vector<1x2x2048xf32> to vector<2x2048xf32>
    %18 = vector.shape_cast %12 : vector<2x2048xf32> to vector<1x2x2048xf32>
    tpu.vector_store %arg6[%c0_13, %c0_14, %c0_15], %18 {strides = array<i32>} : memref<1x2x2048xf32, #tpu.memory_space<vmem>>, vector<1x2x2048xf32>,
    %c2_i32 = arith.constant 2 : i32
    %c0_i32 = arith.constant 0 : i32
    %19 = arith.cmpi eq, %c2_i32, %c0_i32 : i32
    %c1_i32 = arith.constant 1 : i32
    %20 = arith.select %19, %c1_i32, %c2_i32 : i32
    %21 = arith.remsi %arg0, %20 : i32
    %c0_i32_16 = arith.constant 0 : i32
    %22 = arith.cmpi ne, %21, %c0_i32_16 : i32
    %c0_i32_17 = arith.constant 0 : i32
    %23 = arith.cmpi slt, %21, %c0_i32_17 : i32
    %c0_i32_18 = arith.constant 0 : i32
    %24 = arith.cmpi slt, %20, %c0_i32_18 : i32
    %25 = arith.xori %23, %24 : i1
    %26 = arith.andi %25, %22 : i1
    %27 = arith.addi %21, %20 : i32
    %28 = arith.select %26, %27, %21 : i32
    %c0_i32_19 = arith.constant 0 : i32
    %29 = arith.cmpi eq, %28, %c0_i32_19 : i32
    %30 = arith.extui %29 : i1 to i32
    %c0_i32_20 = arith.constant 0 : i32
    %31 = arith.cmpi ne, %30, %c0_i32_20 : i32
    scf.if %31 {
      %35 = vector.extract_strided_slice %12 {offsets = [0, 0], sizes = [2, 512], strides = [1, 1]} : vector<2x2048xf32> to vector<2x512xf32>
      %c0_23 = arith.constant 0 : index
      %c0_24 = arith.constant 0 : index
      %c0_25 = arith.constant 0 : index
      %c0_26 = arith.constant 0 : index
      %36 = vector.load %arg4[%c0_23, %c0_24, %c0_25, %c0_26] : memref<1x2x512x128xf32, #tpu.memory_space<vmem>>, vector<1x1x512x128xf32>
      %37 = vector.shape_cast %36 : vector<1x1x512x128xf32> to vector<512x128xf32>
      %cst_27 = arith.constant dense<0.000000e+00> : vector<2x128xf32>
      %38 = tpu.matmul %35, %37, %cst_27 {dimension_numbers = #tpu.dot_dimension_numbers<[1], [0], [0], [1], [0, 0, 1, 1], [], []>} : vector<2x512xf32>, vector<512x128xf32>, vector<2x128xf32> -> vector<2x128xf32>
      %39 = vector.extract_strided_slice %12 {offsets = [0, 1024], sizes = [2, 512], strides = [1, 1]} : vector<2x2048xf32> to vector<2x512xf32>
      %c0_28 = arith.constant 0 : index
      %c1 = arith.constant 1 : index
      %c0_29 = arith.constant 0 : index
      %c0_30 = arith.constant 0 : index
      %40 = vector.load %arg4[%c0_28, %c1, %c0_29, %c0_30] : memref<1x2x512x128xf32, #tpu.memory_space<vmem>>, vector<1x1x512x128xf32>
      %41 = vector.shape_cast %40 : vector<1x1x512x128xf32> to vector<512x128xf32>
      %cst_31 = arith.constant dense<0.000000e+00> : vector<2x128xf32>
      %42 = tpu.matmul %39, %41, %cst_31 {dimension_numbers = #tpu.dot_dimension_numbers<[1], [0], [0], [1], [0, 0, 1, 1], [], []>} : vector<2x512xf32>, vector<512x128xf32>, vector<2x128xf32> -> vector<2x128xf32>
      %43 = tpu.concatenate %38, %42 in 1 : vector<2x128xf32>, vector<2x128xf32> -> vector<2x256xf32>
      %c0_32 = arith.constant 0 : index
      %c0_33 = arith.constant 0 : index
      %c0_34 = arith.constant 0 : index
      %44 = vector.load %arg7[%c0_32, %c0_33, %c0_34] : memref<1x2x256xf32, #tpu.memory_space<vmem>>, vector<1x2x256xf32>
      %45 = vector.shape_cast %44 : vector<1x2x256xf32> to vector<2x256xf32>
      %46 = vector.shape_cast %43 : vector<2x256xf32> to vector<1x2x256xf32>
      tpu.vector_store %arg7[%c0_32, %c0_33, %c0_34], %46 {strides = array<i32>} : memref<1x2x256xf32, #tpu.memory_space<vmem>>, vector<1x2x256xf32>,
    } else {
    }
    %c1_i32_21 = arith.constant 1 : i32
    %32 = arith.cmpi eq, %28, %c1_i32_21 : i32
    %33 = arith.extui %32 : i1 to i32
    %c0_i32_22 = arith.constant 0 : i32
    %34 = arith.cmpi ne, %33, %c0_i32_22 : i32
    scf.if %34 {
      %35 = vector.extract_strided_slice %12 {offsets = [0, 512], sizes = [2, 512], strides = [1, 1]} : vector<2x2048xf32> to vector<2x512xf32>
      %c0_23 = arith.constant 0 : index
      %c0_24 = arith.constant 0 : index
      %c0_25 = arith.constant 0 : index
      %c0_26 = arith.constant 0 : index
      %36 = vector.load %arg4[%c0_23, %c0_24, %c0_25, %c0_26] : memref<1x2x512x128xf32, #tpu.memory_space<vmem>>, vector<1x1x512x128xf32>
      %37 = vector.shape_cast %36 : vector<1x1x512x128xf32> to vector<512x128xf32>
      %cst_27 = arith.constant dense<0.000000e+00> : vector<2x128xf32>
      %38 = tpu.matmul %35, %37, %cst_27 {dimension_numbers = #tpu.dot_dimension_numbers<[1], [0], [0], [1], [0, 0, 1, 1], [], []>} : vector<2x512xf32>, vector<512x128xf32>, vector<2x128xf32> -> vector<2x128xf32>
      %39 = vector.extract_strided_slice %12 {offsets = [0, 1536], sizes = [2, 512], strides = [1, 1]} : vector<2x2048xf32> to vector<2x512xf32>
      %c0_28 = arith.constant 0 : index
      %c1 = arith.constant 1 : index
      %c0_29 = arith.constant 0 : index
      %c0_30 = arith.constant 0 : index
      %40 = vector.load %arg4[%c0_28, %c1, %c0_29, %c0_30] : memref<1x2x512x128xf32, #tpu.memory_space<vmem>>, vector<1x1x512x128xf32>
      %41 = vector.shape_cast %40 : vector<1x1x512x128xf32> to vector<512x128xf32>
      %cst_31 = arith.constant dense<0.000000e+00> : vector<2x128xf32>
      %42 = tpu.matmul %39, %41, %cst_31 {dimension_numbers = #tpu.dot_dimension_numbers<[1], [0], [0], [1], [0, 0, 1, 1], [], []>} : vector<2x512xf32>, vector<512x128xf32>, vector<2x128xf32> -> vector<2x128xf32>
      %43 = tpu.concatenate %38, %42 in 1 : vector<2x128xf32>, vector<2x128xf32> -> vector<2x256xf32>
      %c0_32 = arith.constant 0 : index
      %c0_33 = arith.constant 0 : index
      %c0_34 = arith.constant 0 : index
      %44 = vector.load %arg7[%c0_32, %c0_33, %c0_34] : memref<1x2x256xf32, #tpu.memory_space<vmem>>, vector<1x2x256xf32>
      %45 = vector.shape_cast %44 : vector<1x2x256xf32> to vector<2x256xf32>
      %46 = vector.shape_cast %43 : vector<2x256xf32> to vector<1x2x256xf32>
      tpu.vector_store %arg7[%c0_32, %c0_33, %c0_34], %46 {strides = array<i32>} : memref<1x2x256xf32, #tpu.memory_space<vmem>>, vector<1x2x256xf32>,
    } else {
    }
    return
  }
  func.func @transform_0(%arg0: i32) -> (i32, i32, i32, i32) {
    %c0_i32 = arith.constant 0 : i32
    %c0_i32_0 = arith.constant 0 : i32
    %c0_i32_1 = arith.constant 0 : i32
    %c0_i32_2 = arith.constant 0 : i32
    return %arg0, %c0_i32, %c0_i32_0, %c0_i32_1 : i32, i32, i32, i32
  }
  func.func @transform_1(%arg0: i32) -> (i32, i32, i32) {
    %c0_i32 = arith.constant 0 : i32
    %c0_i32_0 = arith.constant 0 : i32
    %c0_i32_1 = arith.constant 0 : i32
    return %arg0, %c0_i32, %c0_i32_0 : i32, i32, i32
  }
  func.func @transform_2(%arg0: i32) -> (i32, i32, i32) {
    %c0_i32 = arith.constant 0 : i32
    %c0_i32_0 = arith.constant 0 : i32
    %c0_i32_1 = arith.constant 0 : i32
    return %arg0, %c0_i32, %c0_i32_0 : i32, i32, i32
  }
  func.func @transform_3(%arg0: i32) -> (i32, i32, i32, i32) {
    %c0_i32 = arith.constant 0 : i32
    %c0_i32_0 = arith.constant 0 : i32
    %c0_i32_1 = arith.constant 0 : i32
    %c0_i32_2 = arith.constant 0 : i32
    return %arg0, %c0_i32, %c0_i32_0, %c0_i32_1 : i32, i32, i32, i32
  }
  func.func @transform_4(%arg0: i32) -> (i32, i32, i32) {
    %c0_i32 = arith.constant 0 : i32
    %c0_i32_0 = arith.constant 0 : i32
    %c0_i32_1 = arith.constant 0 : i32
    return %arg0, %c0_i32, %c0_i32_0 : i32, i32, i32
  }
  func.func @transform_5(%arg0: i32) -> (i32, i32, i32) {
    %c0_i32 = arith.constant 0 : i32
    %c0_i32_0 = arith.constant 0 : i32
    %c0_i32_1 = arith.constant 0 : i32
    return %arg0, %c0_i32, %c0_i32_0 : i32, i32, i32
  }
  func.func @transform_6(%arg0: i32) -> (i32, i32, i32) {
    %c0_i32 = arith.constant 0 : i32
    %c0_i32_0 = arith.constant 0 : i32
    %c0_i32_1 = arith.constant 0 : i32
    return %arg0, %c0_i32, %c0_i32_0 : i32, i32, i32
  }
}

</mosaic_0001>

<bundles_post_ra>
// kernel: tpu_custom_call.1
= control target key start
LH: loop header
LB: loop body
LE: loop exit
PB: predicated region body
PF: predicated region fallthrough
CT: control target
= control target key end

     0   :  { %s4206_s0 = inlined_call_operand.hbm [shape: f32[2,2,64,2048], index: 0, kind: input, shape index: {}]   ;;  %s4207_s1 = inlined_call_operand.hbm [shape: f32[2,1,2048], index: 1, kind: input, shape index: {}]   ;;  %s4208_s2 = inlined_call_operand.hbm [shape: f32[2,1,2048], index: 2, kind: input, shape index: {}]   ;;  %s4209_s3 = inlined_call_operand.hbm [shape: f32[2,2,512,128], index: 3, kind: input, shape index: {}]   ;;  %s4210_s4 = inlined_call_operand.hbm [shape: f32[2,2,2048], index: 4, kind: output, shape index: {0}]   ;;  %s4211_s5 = inlined_call_operand.hbm [shape: f32[2,2,2048], index: 5, kind: output, shape index: {1}]   ;;  %s4212_s6 = inlined_call_operand.hbm [shape: f32[2,2,256], index: 6, kind: output, shape index: {2}]  }
   0x1   :  { %4246 = sst [smem:[#allocation54_spill]] %s4206_s0 }
   0x2   :  { %4247 = sst [smem:[#allocation55_spill]] %s4207_s1 }
   0x3   :  { %12 = vsyncpa [#allocation3], 0 }
   0x4   :  { %14 = vsyncpa [#allocation3 + $0x1], 0 }
   0x5   :  { %15 = vsyncpa [#allocation6], 0 }
   0x6   :  { %17 = vsyncpa [#allocation6 + $0x1], 0 }
   0x7   :  { %18 = vsyncpa [#allocation9], 0 }
   0x8   :  { %20 = vsyncpa [#allocation9 + $0x1], 0 }
   0x9   :  { %21 = vsyncpa [#allocation4], 0 }
   0xa   :  { %23 = vsyncpa [#allocation4 + $0x1], 0 }
   0xb   :  { %24 = vsyncpa [#allocation12], 0 }
   0xc   :  { %26 = vsyncpa [#allocation12 + $0x1], 0  ;;  %s2940_s21 = smov 0   ;;  %s2942_s22 = smov 0  }
   0xd   :  { %s2944_s23 = smov 0   ;;  %s2946_s24 = smov 0  }
   0xe LB: > { %4248 = sst [smem:[#allocation19_spill]] %s2896_s23  ;;  %s2961_s25 = sadd.s32 4294967295, %s2900_s24   ;;  %s2900_s24 = sphi %s2946_s24, %s4338_s24   ;;  %s2896_s23 = sphi %s2944_s23, %s4340_s23   ;;  %s2892_s22 = sphi %s2942_s22, %s4342_s22   ;;  %s2888_s21 = sphi %s2940_s21, %s4341_s21  }
   0xf   : > { %s4213_s26 = sadd.s32 4294967294, %s2900_s24   ;;  %s2965_s27 = sadd.s32 1, %s2900_s24  }
  0x10   : > { %4249 = sst [smem:[#allocation20_spill]] %s2965_s27  ;;  %s39_s28 = sadd.s32 1, %s2896_s23 }
  0x11   : > { %s36_s29 = ssub.s32 %s2900_s24, %s2965_s27  ;;  %p46_p0 = scmp.ne.s32.totalorder %s2896_s23, %s2892_s22 }
  0x12   : > { %p37_p1 = scmp.eq.s32.totalorder %s36_s29, 0  ;;  %p47_p2 = scmp.eq.s32.totalorder %s2900_s24, 0 }
  0x13   : > { %p52_p3 = scmp.ne.s32.totalorder %s2892_s22, %s2888_s21  ;;  %p53_p4 = scmp.eq.s32.totalorder %s2961_s25, 0 }
  0x14   : > { %s2977_s30 = scalar_select %p37_p1, %s2896_s23, %s39_s28  }
  0x15   : > { %p48_p5 = por %p47_p2, %p46_p0  ;;  %p2979_p6 = por %p53_p4, %p52_p3 }
  0x16   : > { %4250 = sst [smem:[#allocation21_spill]] %s2977_s30  ;;  %p154_p7 = scmp.eq.s32.totalorder %s2961_s25, 1 }
  0x17   : > { %p160_p8 = scmp.eq.s32.totalorder %s4213_s26, 1  ;;  %p2404_p9 = scmp.ge.s32.totalorder %s2900_s24, 2 }
  0x18   : > { %p2609_p10 = scmp.lt.s32.totalorder %s2900_s24, 2  ;;  %p2988_p11 = por %p154_p7, %p46_p0 }
  0x19   : > { %p2992_p12 = por %p160_p8, %p52_p3  ;;  %s2997_s10 = sand.u32 1, %s2896_s23  }
  0x1a   : > { %p2999_p13 = pnand %p2609_p10, %p48_p5  ;;  %s254_s12 = sand.u32 1, %s2900_s24  }
  0x1b   : > { %s4253_s9 = scalar_select %p2992_p12, 1, 0 }
  0x1c   : > { %s4214_s13 = sshll.u32 %s2997_s10, 4  ;;  %s2409_s14 = sshll.u32 %s2900_s24, 4 }
  0x1d   : > { %4254 = sst [smem:[#allocation22_spill]] %s4253_s9  ;;  %s258_s18 = scalar_lea.vmem [#allocation5], %s4214_s13 }
  0x1e   : > { %s4256_s1 = sld [smem:[#allocation55_spill]]  ;;  %s266_s19 = sshll.u32 %s258_s18, 4  ;;  %s267_s19 = int_to_ptr.vmem [resolvable:$true] %s266_s19 }
  0x1f   : > { %s3011_s28 = scalar_lea.sflag [#allocation6], %s254_s12  ;;  %p2650_p1 = pneg %p2999_p13 }
  0x24   : > { %s262_s17 = scalar_lea.hbm %s4256_s1, %s2409_s14  ;;  %s2653_s13 = scalar_lea.hbm %s4256_s1, 32 }
  0x25   : > { %s264_s20 = sshll.u32 %s262_s17, 4  ;;  %s265_s20 = int_to_ptr.hbm [resolvable:$true] %s264_s20 }
  0x26   : > { %s2646_s29 = sshra.s32 %s265_s20, 4  ;;  %s2647_s29 = int_to_ptr.hbm [resolvable:$true] %s2646_s29 }
  0x27   : > { %s2648_s26 = scalar_lea.hbm %s2647_s29, 16  ;;  %p2654_p4 = scmp.lt.s32.totalorder %s2647_s29, %s4256_s1 }
  0x28   : > { %p2649_p0 = scmp.ne.s32.totalorder %s2647_s29, %s2648_s26  ;;  %p2655_p5 = scmp.lt.s32.totalorder %s2653_s13, %s2648_s26 }
  0x2a   : > { %p2651_p2 = pnand %p2650_p1, %p2649_p0  ;;  %p2656_p7 = por %p2655_p5, %p2654_p4 }
  0x2c   : > { %p2652_p3 = pneg %p2651_p2 }
  0x2e   : > { %p2657_p8 = pnand %p2656_p7, %p2652_p3 }
  0x30   : > { %2660 = shalt.err (!%p2657_p8)
}
  0x31   : > { %2592 = dma.hbm_to_vmem [thread:$0]  (!%p2999_p13), %s265_s20, 256, %s267_s19, %s3011_s28  }
  0x32   : > { %s3030_s16 = scalar_lea.hbm %s4208_s2, %s2409_s14  ;;  %p2415_p10 = scmp.ge.s32.totalorder %s2900_s24, 1 }
  0x33   : > { %p312_p0 = scmp.lt.s32.totalorder %s2900_s24, 3  ;;  %s2405_s26 = sshll.u32 %s2997_s10, 11 }
  0x34   : > { %s2567_s13 = sshll.u32 %s2900_s24, 11  ;;  %s4258_s0 = sld [smem:[#allocation54_spill]] }
  0x35   : > { %p3036_p2 = pnand %p2415_p10, %p312_p0  ;;  %s236_s19 = scalar_lea.vmem [#allocation2], %s2405_s26 }
  0x36   : > { %s244_s20 = sshll.u32 %s236_s19, 4  ;;  %s283_s14 = sshll.u32 %s3030_s16, 4  ;;  %s245_s20 = int_to_ptr.vmem [resolvable:$true] %s244_s20  ;;  %s284_s14 = int_to_ptr.hbm [resolvable:$true] %s283_s14 }
  0x37   : > { %s233_s12 = scalar_lea.sflag [#allocation3], %s2997_s10 }
  0x3a   : > { %s241_s1 = scalar_lea.hbm %s4258_s0, %s2567_s13  ;;  %s2683_s18 = scalar_lea.hbm %s4258_s0, 4096 }
  0x3b   : > { %s242_s30 = sshll.u32 %s241_s1, 4  ;;  %s243_s30 = int_to_ptr.hbm [resolvable:$true] %s242_s30 }
  0x3c   : > { %s2676_s15 = sshra.s32 %s243_s30, 4  ;;  %s2677_s15 = int_to_ptr.hbm [resolvable:$true] %s2676_s15 }
  0x3d   : > { %s2678_s23 = scalar_lea.hbm %s2677_s15, 2048  ;;  %p2684_p7 = scmp.lt.s32.totalorder %s2677_s15, %s4258_s0 }
  0x3e   : > { %p2679_p3 = scmp.ne.s32.totalorder %s2677_s15, %s2678_s23  ;;  %p2685_p8 = scmp.lt.s32.totalorder %s2683_s18, %s2678_s23 }
  0x40   : > { %p2681_p4 = pnand %p2679_p3, %p2650_p1  ;;  %p2686_p10 = por %p2685_p8, %p2684_p7 }
  0x42   : > { %p2682_p5 = pneg %p2681_p4 }
  0x44   : > { %p2687_p0 = pnand %p2686_p10, %p2682_p5 }
  0x46   : > { %2690 = shalt.err (!%p2687_p0)
}
  0x47   : > { %s2902_s1 = smov 2048   ;;  %s2903_s16 = smov 128  }
  0x48   : > { %2589 = dma.hbm_to_vmem [thread:$0]  (!%p2999_p13), %s243_s30, 32768, %s245_s20, %s233_s12, %s2902_s1, %s2902_s1, %s2903_s16  }
  0x49   : > { %s4259_s17 = sshll.u32 %s2997_s10, 4  ;;  %s2706_s19 = sshra.s32 %s284_s14, 4  ;;  %s2707_s19 = int_to_ptr.hbm [resolvable:$true] %s2706_s19 }
  0x4a   : > { %s277_s27 = scalar_lea.vmem [#allocation7], %s4259_s17  ;;  %s2708_s15 = scalar_lea.hbm %s2707_s19, 16 }
  0x4b   : > { %s285_s9 = sshll.u32 %s277_s27, 4  ;;  %p2709_p3 = scmp.ne.s32.totalorder %s2707_s19, %s2708_s15  ;;  %s286_s9 = int_to_ptr.vmem [resolvable:$true] %s285_s9 }
  0x4c   : > { %s2713_s13 = scalar_lea.hbm %s4208_s2, 32  ;;  %p2714_p7 = scmp.lt.s32.totalorder %s2707_s19, %s4208_s2 }
  0x4d   : > { %p2711_p4 = pnand %p2709_p3, %p2650_p1  ;;  %p2715_p8 = scmp.lt.s32.totalorder %s2713_s13, %s2708_s15 }
  0x4f   : > { %p2712_p5 = pneg %p2711_p4  ;;  %p2716_p10 = por %p2715_p8, %p2714_p7 }
  0x51   : > { %p2717_p0 = pnand %p2716_p10, %p2712_p5 }
  0x53   : > { %2720 = shalt.err (!%p2717_p0)
}
  0x54   : > { %2595 = dma.hbm_to_vmem [thread:$0]  (!%p2999_p13), %s284_s14, 256, %s286_s9, %s3011_s28  }
  0x55   : > { %s2412_s30 = sshll.u32 %s2997_s10, 10  ;;  %s2568_s20 = sshll.u32 %s2900_s24, 10 }
  0x56   : > { %s301_s17 = scalar_lea.hbm %s4209_s3, %s2568_s20  ;;  %s296_s27 = scalar_lea.vmem [#allocation8], %s2412_s30 }
  0x57   : > { %s302_s0 = sshll.u32 %s301_s17, 4  ;;  %s304_s19 = sshll.u32 %s296_s27, 4  ;;  %s303_s0 = int_to_ptr.hbm [resolvable:$true] %s302_s0  ;;  %s305_s19 = int_to_ptr.vmem [resolvable:$true] %s304_s19 }
  0x58   : > { %s293_s15 = scalar_lea.sflag [#allocation9], %s2997_s10  ;;  %s2736_s23 = sshra.s32 %s303_s0, 4  ;;  %s2737_s23 = int_to_ptr.hbm [resolvable:$true] %s2736_s23 }
  0x59   : > { %s2738_s18 = scalar_lea.hbm %s2737_s23, 1024  ;;  %s2743_s9 = scalar_lea.hbm %s4209_s3, 2048 }
  0x5a   : > { %p2739_p3 = scmp.ne.s32.totalorder %s2737_s23, %s2738_s18  ;;  %p2744_p7 = scmp.lt.s32.totalorder %s2737_s23, %s4209_s3 }
  0x5b   : > { %p2745_p8 = scmp.lt.s32.totalorder %s2743_s9, %s2738_s18 }
  0x5c   : > { %p2741_p4 = pnand %p2739_p3, %p2650_p1 }
  0x5d   : > { %p2746_p10 = por %p2745_p8, %p2744_p7 }
  0x5e   : > { %p2742_p5 = pneg %p2741_p4 }
  0x60   : > { %p2747_p0 = pnand %p2746_p10, %p2742_p5 }
  0x62   : > { %2750 = shalt.err (!%p2747_p0)
}
  0x63   : > { %s2904_s10 = smov 8   ;;  %316 = sbr.rel (%p3036_p2) target bundleno = 760 (0x2f8), region = 36 }
  0x64   : > { %2598 = dma.hbm_to_vmem [thread:$0]  (!%p2999_p13), %s303_s0, 16384, %s305_s19, %s293_s15, %s2903_s16, %s2903_s16, %s2904_s10  }
  0x68   : > { %s3093_s30 = sand.u32 1, %s2892_s22  }
  0x69   : > { %s2416_s20 = sshll.u32 %s3093_s30, 11  ;;  %s319_s12 = scalar_lea.sflag [#allocation3], %s3093_s30 }
  0x6a   : > { %s3097_s1 = scalar_lea.vmem [#allocation2], %s2416_s20 }
  0x6b   : > { %2867 = dma.done.wait (%p2979_p6), %s319_s12, 32768  }
  0x6c   : > { %2869 = vsyncadd (%p2979_p6), %s319_s12, 4294934528  ;;  %s328_s11 = sand.u32 1, %s2961_s25   ;;  %s2417_s29 = sshll.u32 %s3093_s30, 4 }
  0x6d   : > { %s329_s16 = scalar_lea.sflag [#allocation6], %s328_s11  ;;  %s3107_s17 = scalar_lea.vmem [#allocation5], %s2417_s29 }
  0x6e   : > { %2871 = dma.done.wait (%p2979_p6), %s329_s16, 512  }
  0x6f   : > { %2873 = vsyncadd (%p2979_p6), %s329_s16, 4294966784  ;;  %s2419_s0 = sshll.u32 %s3093_s30, 10  ;;  %s3114_s27 = scalar_lea.vmem [#allocation7], %s2417_s29 }
  0x70   : > { %s349_s19 = scalar_lea.sflag [#allocation9], %s3093_s30  ;;  %s3117_s15 = scalar_lea.vmem [#allocation8], %s2419_s0 }
  0x71   : > { %2875 = dma.done.wait (%p2979_p6), %s349_s19, 16384  }
  0x72   : > { %2877 = vsyncadd (%p2979_p6), %s349_s19, 4294950912  ;;  %s2422_s23 = sshll.u32 %s3093_s30, 2  ;;  %v408_v0 = vld [vmem:[%s3097_s1 + $0x8] sm:$0xff]  ;;  %v409_v1 = vld [vmem:[%s3097_s1 + $0x10] sm:$0xff]  ;;  %s1489_s7 = ssub.s32 0, %s2961_s25  ;;  %vm1303_vm0 = vcmask 1041408  }
  0x73   : > { %v410_v2 = vld [vmem:[%s3097_s1 + $0x18] sm:$0xff]  ;;  %v412_v3 = vld [vmem:[%s3097_s1 + $0x28] sm:$0xff]  ;;  %v413_v4 = vld [vmem:[%s3097_s1 + $0x30] sm:$0xff]  ;;  %s2423_s18 = smin.u32 %s2961_s25, %s1489_s7  ;;  %p1488_p6 = scmp.lt.s32.totalorder %s2961_s25, 0  ;;  %vm1305_vm1 = vcmask 1045508   ;;  %vm1307_vm2 = vcmask 1043456  }
  0x74   : > { %v414_v5 = vld [vmem:[%s3097_s1 + $0x38] sm:$0xff]  ;;  %v416_v6 = vld [vmem:[%s3097_s1 + $0x48] sm:$0xff]  ;;  %v417_v7 = vld [vmem:[%s3097_s1 + $0x50] sm:$0xff]  ;;  %s1491_s28 = sand.u32 1, %s2423_s18   ;;  %vm1335_vm3 = vcmask 1041409   ;;  %s2420_s13 = sshll.u32 %s3093_s30, 5 }
  0x75   : > { %v424_v8 = vld [vmem:[%s3097_s1 + $0x88] sm:$0xff]  ;;  %v425_v9 = vld [vmem:[%s3097_s1 + $0x90] sm:$0xff]  ;;  %v407_v10 = vld [vmem:[%s3097_s1] sm:$0xff]  ;;  %s1492_s14 = ssub.s32 0, %s1491_s28  ;;  %vm1337_vm4 = vcmask 1043459   ;;  %vm1339_vm5 = vcmask 1045509  }
  0x76   : > { %v423_v11 = vld [vmem:[%s3097_s1 + $0x80] sm:$0xff]  ;;  %v426_v12 = vld [vmem:[%s3097_s1 + $0x98] sm:$0xff]  ;;  %v428_v13 = vld [vmem:[%s3097_s1 + $0xa8] sm:$0xff]  ;;  %v676_v28 = vadd.f32 %v424_v8, %v408_v0  ;;  %v689_v29 = vadd.f32 %v425_v9, %v409_v1  ;;  %s4344_s14 = smov (!%p1488_p6, %s1492_s14), %s1491_s28  ;;  %vm1341_vm6 = vcmask 1047559   ;;  %s3734_s26 = scalar_lea.vmem [#allocation10], %s2420_s13 }
  0x77   : > { %v429_v14 = vld [vmem:[%s3097_s1 + $0xb0] sm:$0xff]  ;;  %v411_v15 = vld [vmem:[%s3097_s1 + $0x20] sm:$0xff]  ;;  %v430_v17 = vld [vmem:[%s3097_s1 + $0xb8] sm:$0xff]  ;;  %v702_v30 = vadd.f32 %v426_v12, %v410_v2  ;;  %v728_v31 = vadd.f32 %v428_v13, %v412_v3  ;;  %v663_v44 = vadd.f32 %v423_v11, %v407_v10  ;;  %p2425_p13 = scmp.lt.s32.totalorder %s4344_s14, 0  ;;  %s1498_s9 = sadd.s32 2, %s4344_s14 }
  0x78   : > { %v427_v16 = vld [vmem:[%s3097_s1 + $0xa0] sm:$0xff]  ;;  %v432_v18 = vld [vmem:[%s3097_s1 + $0xc8] sm:$0xff]  ;;  %v433_v19 = vld [vmem:[%s3097_s1 + $0xd0] sm:$0xff]  ;;  %v741_v36 = vadd.f32 %v429_v14, %v413_v4  ;;  %v754_v37 = vadd.f32 %v430_v17, %v414_v5  ;;  %s3814_s10 = scalar_lea.vmem [#allocation11], %s2420_s13  ;;  %s3823_s20 = scalar_lea.vmem [#allocation13], %s2422_s23 }
  0x79   : > { %v439_v20 = vld [vmem:[%s3097_s1 + $0x100] sm:$0xff]  ;;  %v440_v21 = vld [vmem:[%s3097_s1 + $0x108] sm:$0xff]  ;;  %v441_v22 = vld [vmem:[%s3097_s1 + $0x110] sm:$0xff]  ;;  %v3156_v38 = vadd.f32 %v432_v18, %v416_v6  ;;  %v3158_v39 = vadd.f32 %v433_v19, %v417_v7  ;;  %v715_v52 = vadd.f32 %v427_v16, %v411_v15  ;;  %s4346_s9 = smov (!%p2425_p13, %s1498_s9), %s4344_s14 }
  0x7a   : > { %v442_v23 = vld [vmem:[%s3097_s1 + $0x118] sm:$0xff]  ;;  %v443_v24 = vld [vmem:[%s3097_s1 + $0x120] sm:$0xff]  ;;  %v444_v25 = vld [vmem:[%s3097_s1 + $0x128] sm:$0xff]  ;;  %v677_v45 = vadd.f32 %v676_v28, %v440_v21  ;;  %v690_v46 = vadd.f32 %v689_v29, %v441_v22  ;;  %v664_v60 = vadd.f32 %v663_v44, %v439_v20  ;;  %p2426_p1 = scmp.ne.s32.totalorder %s4346_s9, 0 }
  0x7b   : > { %v445_v26 = vld [vmem:[%s3097_s1 + $0x130] sm:$0xff]  ;;  %v446_v27 = vld [vmem:[%s3097_s1 + $0x138] sm:$0xff]  ;;  %v455_v32 = vld [vmem:[%s3097_s1 + $0x180] sm:$0xff]  ;;  %v703_v47 = vadd.f32 %v702_v30, %v442_v23  ;;  %v729_v53 = vadd.f32 %v728_v31, %v444_v25  ;;  %v716_v4 = vadd.f32 %v715_v52, %v443_v24 }
  0x7c   : > { %v456_v33 = vld [vmem:[%s3097_s1 + $0x188] sm:$0xff]  ;;  %v457_v34 = vld [vmem:[%s3097_s1 + $0x190] sm:$0xff]  ;;  %v458_v35 = vld [vmem:[%s3097_s1 + $0x198] sm:$0xff]  ;;  %v742_v54 = vadd.f32 %v741_v36, %v445_v26  ;;  %v755_v55 = vadd.f32 %v754_v37, %v446_v27  ;;  %v665_v12 = vadd.f32 %v664_v60, %v455_v32 }
  0x7d   : > { %v459_v40 = vld [vmem:[%s3097_s1 + $0x1a0] sm:$0xff]  ;;  %v460_v41 = vld [vmem:[%s3097_s1 + $0x1a8] sm:$0xff]  ;;  %v461_v42 = vld [vmem:[%s3097_s1 + $0x1b0] sm:$0xff]  ;;  %v678_v61 = vadd.f32 %v677_v45, %v456_v33  ;;  %v691_v62 = vadd.f32 %v690_v46, %v457_v34  ;;  %v704_v63 = vadd.f32 %v703_v47, %v458_v35 }
  0x7e   : > { %v462_v43 = vld [vmem:[%s3097_s1 + $0x1b8] sm:$0xff]  ;;  %v471_v48 = vld [vmem:[%s3097_s1 + $0x200] sm:$0xff]  ;;  %v472_v49 = vld [vmem:[%s3097_s1 + $0x208] sm:$0xff]  ;;  %v730_v5 = vadd.f32 %v729_v53, %v460_v41  ;;  %v743_v6 = vadd.f32 %v742_v54, %v461_v42  ;;  %v717_v20 = vadd.f32 %v716_v4, %v459_v40 }
  0x7f   : > { %v473_v50 = vld [vmem:[%s3097_s1 + $0x210] sm:$0xff]  ;;  %v474_v51 = vld [vmem:[%s3097_s1 + $0x218] sm:$0xff]  ;;  %v475_v56 = vld [vmem:[%s3097_s1 + $0x220] sm:$0xff]  ;;  %v756_v7 = vadd.f32 %v755_v55, %v462_v43  ;;  %v679_v13 = vadd.f32 %v678_v61, %v472_v49  ;;  %v666_v28 = vadd.f32 %v665_v12, %v471_v48 }
  0x80   : > { %v476_v57 = vld [vmem:[%s3097_s1 + $0x228] sm:$0xff]  ;;  %v477_v58 = vld [vmem:[%s3097_s1 + $0x230] sm:$0xff]  ;;  %v478_v59 = vld [vmem:[%s3097_s1 + $0x238] sm:$0xff]  ;;  %v692_v14 = vadd.f32 %v691_v62, %v473_v50  ;;  %v705_v15 = vadd.f32 %v704_v63, %v474_v51  ;;  %v718_v35 = vadd.f32 %v717_v20, %v475_v56 }
  0x81   : > { %v487_v0 = vld [vmem:[%s3097_s1 + $0x280] sm:$0xff]  ;;  %v488_v1 = vld [vmem:[%s3097_s1 + $0x288] sm:$0xff]  ;;  %v489_v2 = vld [vmem:[%s3097_s1 + $0x290] sm:$0xff]  ;;  %v731_v21 = vadd.f32 %v730_v5, %v476_v57  ;;  %v744_v22 = vadd.f32 %v743_v6, %v477_v58  ;;  %v757_v23 = vadd.f32 %v756_v7, %v478_v59 }
  0x82   : > { %v490_v3 = vld [vmem:[%s3097_s1 + $0x298] sm:$0xff]  ;;  %v491_v8 = vld [vmem:[%s3097_s1 + $0x2a0] sm:$0xff]  ;;  %v492_v9 = vld [vmem:[%s3097_s1 + $0x2a8] sm:$0xff]  ;;  %v680_v29 = vadd.f32 %v679_v13, %v488_v1  ;;  %v693_v30 = vadd.f32 %v692_v14, %v489_v2  ;;  %v667_v44 = vadd.f32 %v666_v28, %v487_v0 }
  0x83   : > { %v493_v10 = vld [vmem:[%s3097_s1 + $0x2b0] sm:$0xff]  ;;  %v494_v11 = vld [vmem:[%s3097_s1 + $0x2b8] sm:$0xff]  ;;  %v503_v16 = vld [vmem:[%s3097_s1 + $0x300] sm:$0xff]  ;;  %v706_v31 = vadd.f32 %v705_v15, %v490_v3  ;;  %v732_v36 = vadd.f32 %v731_v21, %v492_v9  ;;  %v719_v49 = vadd.f32 %v718_v35, %v491_v8 }
  0x84   : > { %v504_v17 = vld [vmem:[%s3097_s1 + $0x308] sm:$0xff]  ;;  %v505_v18 = vld [vmem:[%s3097_s1 + $0x310] sm:$0xff]  ;;  %v506_v19 = vld [vmem:[%s3097_s1 + $0x318] sm:$0xff]  ;;  %v745_v37 = vadd.f32 %v744_v22, %v493_v10  ;;  %v758_v40 = vadd.f32 %v757_v23, %v494_v11  ;;  %v668_v54 = vadd.f32 %v667_v44, %v503_v16 }
  0x85   : > { %v507_v24 = vld [vmem:[%s3097_s1 + $0x320] sm:$0xff]  ;;  %v508_v25 = vld [vmem:[%s3097_s1 + $0x328] sm:$0xff]  ;;  %v509_v26 = vld [vmem:[%s3097_s1 + $0x330] sm:$0xff]  ;;  %v681_v45 = vadd.f32 %v680_v29, %v504_v17  ;;  %v694_v46 = vadd.f32 %v693_v30, %v505_v18  ;;  %v707_v47 = vadd.f32 %v706_v31, %v506_v19 }
  0x86   : > { %v510_v27 = vld [vmem:[%s3097_s1 + $0x338] sm:$0xff]  ;;  %v520_v32 = vld [vmem:[%s3097_s1 + $0x388] sm:$0xff]  ;;  %v521_v33 = vld [vmem:[%s3097_s1 + $0x390] sm:$0xff]  ;;  %v733_v50 = vadd.f32 %v732_v36, %v508_v25  ;;  %v746_v51 = vadd.f32 %v745_v37, %v509_v26  ;;  %v720_v58 = vadd.f32 %v719_v49, %v507_v24 }
  0x87   : > { %v522_v34 = vld [vmem:[%s3097_s1 + $0x398] sm:$0xff]  ;;  %v524_v41 = vld [vmem:[%s3097_s1 + $0x3a8] sm:$0xff]  ;;  %v525_v42 = vld [vmem:[%s3097_s1 + $0x3b0] sm:$0xff]  ;;  %v759_v52 = vadd.f32 %v758_v40, %v510_v27  ;;  %v682_v55 = vadd.f32 %v681_v45, %v520_v32  ;;  %v695_v56 = vadd.f32 %v694_v46, %v521_v33 }
  0x88   : > { %v526_v43 = vld [vmem:[%s3097_s1 + $0x3b8] sm:$0xff]  ;;  %v519_v48 = vld [vmem:[%s3097_s1 + $0x380] sm:$0xff]  ;;  %v708_v57 = vadd.f32 %v707_v47, %v522_v34  ;;  %v734_v59 = vadd.f32 %v733_v50, %v524_v41  ;;  %v747_v60 = vadd.f32 %v746_v51, %v525_v42  ;;  %v420_v34 = vld [vmem:[%s3097_s1 + $0x68] sm:$0xff] }
  0x89   : > { %v523_v53 = vld [vmem:[%s3097_s1 + $0x3a0] sm:$0xff]  ;;  %v760_v61 = vadd.f32 %v759_v52, %v526_v43  ;;  %v669_v62 = vadd.f32 %v668_v54, %v519_v48  ;;  %v683_v63 = vrot.slane %v682_v55, 4  ;;  %v696_v0 = vrot.slane %v695_v56, 4  ;;  %v418_v32 = vld [vmem:[%s3097_s1 + $0x58] sm:$0xff]  ;;  %v436_v37 = vld [vmem:[%s3097_s1 + $0xe8] sm:$0xff] }
  0x8a   : > { %v709_v1 = vrot.slane %v708_v57, 4  ;;  %v721_v2 = vadd.f32 %v720_v58, %v523_v53  ;;  %v735_v3 = vrot.slane %v734_v59, 4  ;;  %v748_v4 = vrot.slane %v747_v60, 4  ;;  %v415_v26 = vld [vmem:[%s3097_s1 + $0x40] sm:$0xff]  ;;  %v434_v35 = vld [vmem:[%s3097_s1 + $0xd8] sm:$0xff]  ;;  %v421_v44 = vld [vmem:[%s3097_s1 + $0x70] sm:$0xff] }
  0x8b   : > { %v761_v5 = vrot.slane %v760_v61, 4  ;;  %v670_v6 = vrot.slane %v669_v62, 4  ;;  %v684_v7 = vadd.f32 %v683_v63, %v682_v55  ;;  %v697_v8 = vadd.f32 %v696_v0, %v695_v56  ;;  %v431_v27 = vld [vmem:[%s3097_s1 + $0xc0] sm:$0xff]  ;;  %v437_v45 = vld [vmem:[%s3097_s1 + $0xf0] sm:$0xff]  ;;  %v448_v47 = vld [vmem:[%s3097_s1 + $0x148] sm:$0xff] }
  0x8c   : > { %v710_v9 = vadd.f32 %v709_v1, %v708_v57  ;;  %v722_v10 = vrot.slane %v721_v2, 4  ;;  %v736_v11 = vadd.f32 %v735_v3, %v734_v59  ;;  %v749_v12 = vadd.f32 %v748_v4, %v747_v60  ;;  %v419_v33 = vld [vmem:[%s3097_s1 + $0x60] sm:$0xff]  ;;  %v449_v48 = vld [vmem:[%s3097_s1 + $0x150] sm:$0xff]  ;;  %v422_v53 = vld [vmem:[%s3097_s1 + $0x78] sm:$0xff] }
  0x8d   : > { %v762_v13 = vadd.f32 %v761_v5, %v760_v61  ;;  %v671_v14 = vadd.f32 %v670_v6, %v669_v62  ;;  %v685_v15 = vrot.slane %v684_v7, 2  ;;  %v698_v16 = vrot.slane %v697_v8, 2  ;;  %v435_v36 = vld [vmem:[%s3097_s1 + $0xe0] sm:$0xff]  ;;  %v438_v54 = vld [vmem:[%s3097_s1 + $0xf8] sm:$0xff]  ;;  %v452_v57 = vld [vmem:[%s3097_s1 + $0x168] sm:$0xff] }
  0x8e   : > { %v711_v17 = vrot.slane %v710_v9, 2  ;;  %v723_v18 = vadd.f32 %v722_v10, %v721_v2  ;;  %v737_v19 = vrot.slane %v736_v11, 2  ;;  %v750_v20 = vrot.slane %v749_v12, 2  ;;  %v447_v46 = vld [vmem:[%s3097_s1 + $0x140] sm:$0xff]  ;;  %v450_v55 = vld [vmem:[%s3097_s1 + $0x158] sm:$0xff]  ;;  %v453_v61 = vld [vmem:[%s3097_s1 + $0x170] sm:$0xff] }
  0x8f   : > { %v763_v21 = vrot.slane %v762_v13, 2  ;;  %v672_v22 = vrot.slane %v671_v14, 2  ;;  %v686_v23 = vadd.f32 %v685_v15, %v684_v7  ;;  %v699_v24 = vadd.f32 %v698_v16, %v697_v8  ;;  %v451_v56 = vld [vmem:[%s3097_s1 + $0x160] sm:$0xff]  ;;  %v464_v63 = vld [vmem:[%s3097_s1 + $0x1c8] sm:$0xff]  ;;  %v465_v0 = vld [vmem:[%s3097_s1 + $0x1d0] sm:$0xff] }
  0x90   : > { %v712_v25 = vadd.f32 %v711_v17, %v710_v9  ;;  %v724_v28 = vrot.slane %v723_v18, 2  ;;  %v738_v29 = vadd.f32 %v737_v19, %v736_v11  ;;  %v751_v30 = vadd.f32 %v750_v20, %v749_v12  ;;  %v463_v62 = vld [vmem:[%s3097_s1 + $0x1c0] sm:$0xff]  ;;  %v454_v5 = vld [vmem:[%s3097_s1 + $0x178] sm:$0xff]  ;;  %v468_v8 = vld [vmem:[%s3097_s1 + $0x1e8] sm:$0xff] }
  0x91   : > { %v764_v31 = vadd.f32 %v763_v21, %v762_v13  ;;  %v673_v40 = vadd.f32 %v672_v22, %v671_v14  ;;  %v687_v41 = vrot.slane %v686_v23, 1  ;;  %v700_v42 = vrot.slane %v699_v24, 1  ;;  %v466_v6 = vld [vmem:[%s3097_s1 + $0x1d8] sm:$0xff]  ;;  %v467_v7 = vld [vmem:[%s3097_s1 + $0x1e0] sm:$0xff]  ;;  %v469_v13 = vld [vmem:[%s3097_s1 + $0x1f0] sm:$0xff] }
  0x92   : > { %v713_v43 = vrot.slane %v712_v25, 1  ;;  %v3209_v49 = vadd.f32 %v724_v28, %v723_v18  ;;  %v739_v50 = vrot.slane %v738_v29, 1  ;;  %v752_v51 = vrot.slane %v751_v30, 1  ;;  %v479_v14 = vld [vmem:[%s3097_s1 + $0x240] sm:$0xff]  ;;  %v480_v15 = vld [vmem:[%s3097_s1 + $0x248] sm:$0xff]  ;;  %v481_v16 = vld [vmem:[%s3097_s1 + $0x250] sm:$0xff] }
  0x93   : > { %v765_v52 = vrot.slane %v764_v31, 1  ;;  %v674_v58 = vrot.slane %v673_v40, 1  ;;  %v3216_v59 = vadd.f32 %v687_v41, %v686_v23  ;;  %v3218_v60 = vadd.f32 %v700_v42, %v699_v24  ;;  %v470_v21 = vld [vmem:[%s3097_s1 + $0x1f8] sm:$0xff]  ;;  %v484_v23 = vld [vmem:[%s3097_s1 + $0x268] sm:$0xff] }
  0x94   : > { %v3224_v1 = vadd.f32 %v713_v43, %v712_v25  ;;  %v726_v2 = vrot.slane %v3209_v49, 1  ;;  %v3227_v3 = vadd.f32 %v739_v50, %v738_v29  ;;  %v3229_v4 = vadd.f32 %v752_v51, %v751_v30  ;;  %v482_v22 = vld [vmem:[%s3097_s1 + $0x258] sm:$0xff]  ;;  %v496_v28 = vld [vmem:[%s3097_s1 + $0x2c8] sm:$0xff]  ;;  %v497_v29 = vld [vmem:[%s3097_s1 + $0x2d0] sm:$0xff] }
  0x95   : > { %v3235_v9 = vadd.f32 %v765_v52, %v764_v31  ;;  %v767_v10 = vadd.f32 %v431_v27, %v415_v26  ;;  %v781_v11 = vadd.f32 %v3156_v38, %v448_v47  ;;  %v794_v12 = vadd.f32 %v3158_v39, %v449_v48  ;;  %v483_v38 = vld [vmem:[%s3097_s1 + $0x260] sm:$0xff]  ;;  %v485_v27 = vld [vmem:[%s3097_s1 + $0x270] sm:$0xff]  ;;  %v500_v51 = vld [vmem:[%s3097_s1 + $0x2e8] sm:$0xff] }
  0x96   : > { %v3243_v17 = vadd.f32 %v674_v58, %v673_v40  ;;  %v806_v18 = vadd.f32 %v434_v35, %v418_v32  ;;  %v819_v19 = vadd.f32 %v435_v36, %v419_v33  ;;  %v832_v20 = vadd.f32 %v436_v37, %v420_v34  ;;  %v486_v34 = vld [vmem:[%s3097_s1 + $0x278] sm:$0xff]  ;;  %v495_v35 = vld [vmem:[%s3097_s1 + $0x2c0] sm:$0xff]  ;;  %v501_v52 = vld [vmem:[%s3097_s1 + $0x2f0] sm:$0xff] }
  0x97   : > { %v768_v39 = vadd.f32 %v767_v10, %v447_v46  ;;  %v782_v24 = vadd.f32 %v781_v11, %v464_v63  ;;  %v795_v25 = vadd.f32 %v794_v12, %v465_v0  ;;  %v845_v26 = vadd.f32 %v437_v45, %v421_v44  ;;  %v498_v36 = vld [vmem:[%s3097_s1 + $0x2d8] sm:$0xff]  ;;  %v499_v43 = vld [vmem:[%s3097_s1 + $0x2e0] sm:$0xff]  ;;  %v512_v44 = vld [vmem:[%s3097_s1 + $0x348] sm:$0xff] }
  0x98   : > { %v807_v30 = vadd.f32 %v806_v18, %v450_v55  ;;  %v820_v31 = vadd.f32 %v819_v19, %v451_v56  ;;  %v833_v32 = vadd.f32 %v832_v20, %v452_v57  ;;  %v858_v33 = vadd.f32 %v438_v54, %v422_v53  ;;  %v513_v45 = vld [vmem:[%s3097_s1 + $0x350] sm:$0xff]  ;;  %v502_v53 = vld [vmem:[%s3097_s1 + $0x2f8] sm:$0xff]  ;;  %v511_v58 = vld [vmem:[%s3097_s1 + $0x340] sm:$0xff] }
  0x99   : > { %v769_v37 = vadd.f32 %v768_v39, %v463_v62  ;;  %v783_v40 = vadd.f32 %v782_v24, %v480_v15  ;;  %v796_v41 = vadd.f32 %v795_v25, %v481_v16  ;;  %v846_v42 = vadd.f32 %v845_v26, %v453_v61  ;;  %v528_v61 = vld [vmem:[%s3097_s1 + $0x3c8] sm:$0xff]  ;;  %v529_v62 = vld [vmem:[%s3097_s1 + $0x3d0] sm:$0xff]  ;;  %v518_v16 = vld [vmem:[%s3097_s1 + $0x378] sm:$0xff] }
  0x9a   : > { %v808_v46 = vadd.f32 %v807_v30, %v466_v6  ;;  %v821_v47 = vadd.f32 %v820_v31, %v467_v7  ;;  %v834_v48 = vadd.f32 %v833_v32, %v468_v8  ;;  %v859_v50 = vadd.f32 %v858_v33, %v454_v5  ;;  %v514_v7 = vld [vmem:[%s3097_s1 + $0x358] sm:$0xff]  ;;  %v515_v8 = vld [vmem:[%s3097_s1 + $0x360] sm:$0xff]  ;;  %v516_v10 = vld [vmem:[%s3097_s1 + $0x368] sm:$0xff] }
  0x9b   : > { %v770_v54 = vadd.f32 %v769_v37, %v479_v14  ;;  %v784_v55 = vadd.f32 %v783_v40, %v496_v28  ;;  %v797_v56 = vadd.f32 %v796_v41, %v497_v29  ;;  %v847_v57 = vadd.f32 %v846_v42, %v469_v13  ;;  %v517_v15 = vld [vmem:[%s3097_s1 + $0x370] sm:$0xff]  ;;  %v527_v18 = vld [vmem:[%s3097_s1 + $0x3c0] sm:$0xff]  ;;  %v532_v39 = vld [vmem:[%s3097_s1 + $0x3e8] sm:$0xff] }
  0x9c   : > { %v809_v63 = vadd.f32 %v808_v46, %v482_v22  ;;  %v822_v0 = vadd.f32 %v821_v47, %v483_v38  ;;  %v835_v6 = vadd.f32 %v834_v48, %v484_v23  ;;  %v860_v5 = vadd.f32 %v859_v50, %v470_v21  ;;  %v530_v23 = vld [vmem:[%s3097_s1 + $0x3d8] sm:$0xff]  ;;  %v531_v21 = vld [vmem:[%s3097_s1 + $0x3e0] sm:$0xff]  ;;  %v533_v29 = vld [vmem:[%s3097_s1 + $0x3f0] sm:$0xff] }
  0x9d   : > { %v771_v11 = vadd.f32 %v770_v54, %v495_v35  ;;  %v785_v12 = vadd.f32 %v784_v55, %v512_v44  ;;  %v798_v14 = vadd.f32 %v797_v56, %v513_v45  ;;  %v848_v13 = vadd.f32 %v847_v57, %v485_v27  ;;  %v534_v33 = vld [vmem:[%s3097_s1 + $0x3f8] sm:$0xff] }
  0x9e   : > { %v810_v19 = vadd.f32 %v809_v63, %v498_v36  ;;  %v823_v20 = vadd.f32 %v822_v0, %v499_v43  ;;  %v836_v22 = vadd.f32 %v835_v6, %v500_v51  ;;  %v861_v38 = vadd.f32 %v860_v5, %v486_v34 }
  0x9f   : > { %v772_v24 = vadd.f32 %v771_v11, %v511_v58  ;;  %v786_v25 = vadd.f32 %v785_v12, %v528_v61  ;;  %v799_v26 = vadd.f32 %v798_v14, %v529_v62  ;;  %v849_v28 = vadd.f32 %v848_v13, %v501_v52  ;;  %v535_v12 = vld [vmem:[%s3097_s1 + $0x400] sm:$0xff]  ;;  %v536_v14 = vld [vmem:[%s3097_s1 + $0x408] sm:$0xff] }
  0xa0   : > { %v811_v30 = vadd.f32 %v810_v19, %v514_v7  ;;  %v824_v31 = vadd.f32 %v823_v20, %v515_v8  ;;  %v837_v27 = vadd.f32 %v836_v22, %v516_v10  ;;  %v862_v32 = vadd.f32 %v861_v38, %v502_v53  ;;  %v537_v19 = vld [vmem:[%s3097_s1 + $0x410] sm:$0xff]  ;;  %v551_v20 = vld [vmem:[%s3097_s1 + $0x480] sm:$0xff]  ;;  %v552_v22 = vld [vmem:[%s3097_s1 + $0x488] sm:$0xff] }
  0xa1   : > { %v773_v35 = vadd.f32 %v772_v24, %v527_v18  ;;  %v787_v36 = vrot.slane %v786_v25, 4  ;;  %v800_v37 = vrot.slane %v799_v26, 4  ;;  %v850_v34 = vadd.f32 %v849_v28, %v517_v15  ;;  %v553_v38 = vld [vmem:[%s3097_s1 + $0x490] sm:$0xff]  ;;  %v540_v28 = vld [vmem:[%s3097_s1 + $0x428] sm:$0xff] }
  0xa2   : > { %v812_v40 = vadd.f32 %v811_v30, %v530_v23  ;;  %v825_v41 = vadd.f32 %v824_v31, %v531_v21  ;;  %v838_v42 = vadd.f32 %v837_v27, %v532_v39  ;;  %v863_v43 = vadd.f32 %v862_v32, %v518_v16  ;;  %v555_v30 = vld [vmem:[%s3097_s1 + $0x4a0] sm:$0xff]  ;;  %v556_v31 = vld [vmem:[%s3097_s1 + $0x4a8] sm:$0xff] }
  0xa3   : > { %v774_v44 = vrot.slane %v773_v35, 4  ;;  %v788_v45 = vadd.f32 %v787_v36, %v786_v25  ;;  %v801_v46 = vadd.f32 %v800_v37, %v799_v26  ;;  %v851_v47 = vadd.f32 %v850_v34, %v533_v29  ;;  %v538_v25 = vld [vmem:[%s3097_s1 + $0x418] sm:$0xff]  ;;  %v539_v26 = vld [vmem:[%s3097_s1 + $0x420] sm:$0xff]  ;;  %v541_v36 = vld [vmem:[%s3097_s1 + $0x430] sm:$0xff] }
  0xa4   : > { %v813_v48 = vrot.slane %v812_v40, 4  ;;  %v826_v50 = vrot.slane %v825_v41, 4  ;;  %v839_v51 = vrot.slane %v838_v42, 4  ;;  %v864_v52 = vadd.f32 %v863_v43, %v534_v33  ;;  %v554_v29 = vld [vmem:[%s3097_s1 + $0x498] sm:$0xff]  ;;  %v557_v37 = vld [vmem:[%s3097_s1 + $0x4b0] sm:$0xff]  ;;  %v567_v34 = vld [vmem:[%s3097_s1 + $0x500] sm:$0xff] }
  0xa5   : > { %v775_v53 = vadd.f32 %v774_v44, %v773_v35  ;;  %v789_v54 = vrot.slane %v788_v45, 2  ;;  %v802_v55 = vrot.slane %v801_v46, 2  ;;  %v852_v56 = vrot.slane %v851_v47, 4 }
  0xa6   : > { %v814_v57 = vadd.f32 %v813_v48, %v812_v40  ;;  %v827_v58 = vadd.f32 %v826_v50, %v825_v41  ;;  %v840_v61 = vadd.f32 %v839_v51, %v838_v42  ;;  %v865_v62 = vrot.slane %v864_v52, 4  ;;  %v568_v40 = vld [vmem:[%s3097_s1 + $0x508] sm:$0xff]  ;;  %v569_v41 = vld [vmem:[%s3097_s1 + $0x510] sm:$0xff] }
  0xa7   : > { %v776_v63 = vrot.slane %v775_v53, 2  ;;  %v790_v0 = vadd.f32 %v789_v54, %v788_v45  ;;  %v803_v6 = vadd.f32 %v802_v55, %v801_v46  ;;  %v853_v5 = vadd.f32 %v852_v56, %v851_v47  ;;  %v558_v45 = vld [vmem:[%s3097_s1 + $0x4b8] sm:$0xff]  ;;  %v571_v47 = vld [vmem:[%s3097_s1 + $0x520] sm:$0xff]  ;;  %v572_v48 = vld [vmem:[%s3097_s1 + $0x528] sm:$0xff] }
  0xa8   : > { %v815_v7 = vrot.slane %v814_v57, 2  ;;  %v828_v8 = vrot.slane %v827_v58, 2  ;;  %v841_v10 = vrot.slane %v840_v61, 2  ;;  %v866_v11 = vadd.f32 %v865_v62, %v864_v52  ;;  %v570_v46 = vld [vmem:[%s3097_s1 + $0x518] sm:$0xff]  ;;  %v573_v54 = vld [vmem:[%s3097_s1 + $0x530] sm:$0xff]  ;;  %v583_v55 = vld [vmem:[%s3097_s1 + $0x580] sm:$0xff] }
  0xa9   : > { %v777_v13 = vadd.f32 %v776_v63, %v775_v53  ;;  %v791_v15 = vrot.slane %v790_v0, 1  ;;  %v804_v16 = vrot.slane %v803_v6, 1  ;;  %v854_v18 = vrot.slane %v853_v5, 2  ;;  %v584_v56 = vld [vmem:[%s3097_s1 + $0x588] sm:$0xff] }
  0xaa   : > { %v816_v23 = vadd.f32 %v815_v7, %v814_v57  ;;  %v829_v21 = vadd.f32 %v828_v8, %v827_v58  ;;  %v842_v39 = vadd.f32 %v841_v10, %v840_v61  ;;  %v867_v24 = vrot.slane %v866_v11, 2  ;;  %v585_v57 = vld [vmem:[%s3097_s1 + $0x590] sm:$0xff]  ;;  %v588_v7 = vld [vmem:[%s3097_s1 + $0x5a8] sm:$0xff] }
  0xab   : > { %v3296_v27 = vadd.f32 %v726_v2, %v3209_v49  ;;  %v778_v32 = vrot.slane %v777_v13, 1  ;;  %v3298_v33 = vadd.f32 %v791_v15, %v790_v0  ;;  %v855_v35 = vadd.f32 %v854_v18, %v853_v5  ;;  %v542_v2 = vld [vmem:[%s3097_s1 + $0x438] sm:$0xff]  ;;  %v587_v5 = vld [vmem:[%s3097_s1 + $0x5a0] sm:$0xff]  ;;  %v600_v15 = vld [vmem:[%s3097_s1 + $0x608] sm:$0xff] }
  0xac   : > { %v817_v42 = vrot.slane %v816_v23, 1  ;;  %v830_v43 = vrot.slane %v829_v21, 1  ;;  %v843_v44 = vrot.slane %v842_v39, 1  ;;  %v3305_v49 = vadd.f32 %v867_v24, %v866_v11  ;;  %v574_v0 = vld [vmem:[%s3097_s1 + $0x538] sm:$0xff]  ;;  %v603_v24 = vld [vmem:[%s3097_s1 + $0x620] sm:$0xff] }
  0xad   : > { %v3312_v50 = vadd.f32 %v804_v16, %v803_v6  ;;  %v856_v51 = vrot.slane %v855_v35, 1  ;;  %v871_v52 = vadd.f32 %v551_v20, %v535_v12  ;;  %v884_v53 = vadd.f32 %v552_v22, %v536_v14  ;;  %v586_v6 = vld [vmem:[%s3097_s1 + $0x598] sm:$0xff]  ;;  %v589_v14 = vld [vmem:[%s3097_s1 + $0x5b0] sm:$0xff] }
  0xae   : > { %v3318_v58 = vadd.f32 %v778_v32, %v777_v13  ;;  %v3320_v61 = vadd.f32 %v817_v42, %v816_v23  ;;  %v3322_v62 = vadd.f32 %v830_v43, %v829_v21  ;;  %v3324_v63 = vadd.f32 %v843_v44, %v842_v39  ;;  %v599_v13 = vld [vmem:[%s3097_s1 + $0x600] sm:$0xff]  ;;  %v601_v16 = vld [vmem:[%s3097_s1 + $0x610] sm:$0xff]  ;;  %v590_v21 = vld [vmem:[%s3097_s1 + $0x5b8] sm:$0xff] }
  0xaf   : > { %v869_v8 = vrot.slane %v3305_v49, 1  ;;  %v872_v10 = vadd.f32 %v871_v52, %v567_v34  ;;  %v885_v11 = vadd.f32 %v884_v53, %v568_v40  ;;  %v897_v12 = vadd.f32 %v553_v38, %v537_v19  ;;  %v602_v39 = vld [vmem:[%s3097_s1 + $0x618] sm:$0xff]  ;;  %v604_v32 = vld [vmem:[%s3097_s1 + $0x628] sm:$0xff]  ;;  %v605_v42 = vld [vmem:[%s3097_s1 + $0x630] sm:$0xff] }
  0xb0   : > { %v3335_v18 = vadd.f32 %v856_v51, %v855_v35  ;;  %v910_v20 = vadd.f32 %v554_v29, %v538_v25  ;;  %v923_v22 = vadd.f32 %v555_v30, %v539_v26  ;;  %v936_v23 = vadd.f32 %v556_v31, %v540_v28  ;;  %v615_v35 = vld [vmem:[%s3097_s1 + $0x680] sm:$0xff]  ;;  %v616_v43 = vld [vmem:[%s3097_s1 + $0x688] sm:$0xff]  ;;  %v606_v30 = vld [vmem:[%s3097_s1 + $0x638] sm:$0xff] }
  0xb1   : > { %v873_v19 = vadd.f32 %v872_v10, %v583_v55  ;;  %v886_v38 = vadd.f32 %v885_v11, %v584_v56  ;;  %v898_v34 = vadd.f32 %v897_v12, %v569_v41  ;;  %v949_v40 = vadd.f32 %v557_v37, %v541_v36  ;;  %v617_v31 = vld [vmem:[%s3097_s1 + $0x690] sm:$0xff]  ;;  %v618_v44 = vld [vmem:[%s3097_s1 + $0x698] sm:$0xff]  ;;  %v619_v37 = vld [vmem:[%s3097_s1 + $0x6a0] sm:$0xff] }
  0xb2   : > { %v911_v25 = vadd.f32 %v910_v20, %v570_v46  ;;  %v924_v26 = vadd.f32 %v923_v22, %v571_v47  ;;  %v937_v28 = vadd.f32 %v936_v23, %v572_v48  ;;  %v962_v29 = vadd.f32 %v558_v45, %v542_v2  ;;  %v631_v53 = vld [vmem:[%s3097_s1 + $0x700] sm:$0xff]  ;;  %v632_v55 = vld [vmem:[%s3097_s1 + $0x708] sm:$0xff]  ;;  %v621_v56 = vld [vmem:[%s3097_s1 + $0x6b0] sm:$0xff] }
  0xb3   : > { %v874_v51 = vadd.f32 %v873_v19, %v599_v13  ;;  %v887_v52 = vadd.f32 %v886_v38, %v600_v15  ;;  %v899_v41 = vadd.f32 %v898_v34, %v585_v57  ;;  %v950_v36 = vadd.f32 %v949_v40, %v573_v54  ;;  %v620_v45 = vld [vmem:[%s3097_s1 + $0x6a8] sm:$0xff]  ;;  %v622_v10 = vld [vmem:[%s3097_s1 + $0x6b8] sm:$0xff]  ;;  %v633_v13 = vld [vmem:[%s3097_s1 + $0x710] sm:$0xff] }
  0xb4   : > { %v912_v46 = vadd.f32 %v911_v25, %v586_v6  ;;  %v925_v47 = vadd.f32 %v924_v26, %v587_v5  ;;  %v938_v48 = vadd.f32 %v937_v28, %v588_v7  ;;  %v963_v2 = vadd.f32 %v962_v29, %v574_v0  ;;  %v647_v15 = vld [vmem:[%s3097_s1 + $0x780] sm:$0xff]  ;;  %v648_v20 = vld [vmem:[%s3097_s1 + $0x788] sm:$0xff]  ;;  %v634_v22 = vld [vmem:[%s3097_s1 + $0x718] sm:$0xff] }
  0xb5   : > { %v875_v11 = vadd.f32 %v874_v51, %v615_v35  ;;  %v888_v12 = vadd.f32 %v887_v52, %v616_v43  ;;  %v900_v57 = vadd.f32 %v899_v41, %v601_v16  ;;  %v951_v54 = vadd.f32 %v950_v36, %v589_v14  ;;  %v635_v23 = vld [vmem:[%s3097_s1 + $0x720] sm:$0xff]  ;;  %v636_v19 = vld [vmem:[%s3097_s1 + $0x728] sm:$0xff]  ;;  %v637_v40 = vld [vmem:[%s3097_s1 + $0x730] sm:$0xff] }
  0xb6   : > { %v913_v6 = vadd.f32 %v912_v46, %v602_v39  ;;  %v926_v5 = vadd.f32 %v925_v47, %v603_v24  ;;  %v939_v7 = vadd.f32 %v938_v48, %v604_v32  ;;  %v964_v0 = vadd.f32 %v963_v2, %v590_v21  ;;  %v638_v35 = vld [vmem:[%s3097_s1 + $0x738] sm:$0xff]  ;;  %v649_v43 = vld [vmem:[%s3097_s1 + $0x790] sm:$0xff]  ;;  %v651_v21 = vld [vmem:[%s3097_s1 + $0x7a0] sm:$0xff] }
  0xb7   : > { %v876_v38 = vadd.f32 %v875_v11, %v631_v53  ;;  %v889_v34 = vadd.f32 %v888_v12, %v632_v55  ;;  %v901_v16 = vadd.f32 %v900_v57, %v617_v31  ;;  %v952_v14 = vadd.f32 %v951_v54, %v605_v42  ;;  %v650_v26 = vld [vmem:[%s3097_s1 + $0x798] sm:$0xff]  ;;  %v652_v28 = vld [vmem:[%s3097_s1 + $0x7a8] sm:$0xff]  ;;  %v653_v36 = vld [vmem:[%s3097_s1 + $0x7b0] sm:$0xff] }
  0xb8   : > { %v914_v25 = vadd.f32 %v913_v6, %v618_v44  ;;  %v927_v39 = vadd.f32 %v926_v5, %v619_v37  ;;  %v940_v24 = vadd.f32 %v939_v7, %v620_v45  ;;  %v965_v32 = vadd.f32 %v964_v0, %v606_v30  ;;  %v654_v46 = vld [vmem:[%s3097_s1 + $0x7b8] sm:$0xff] }
  0xb9   : > { %v877_v29 = vadd.f32 %v876_v38, %v647_v15  ;;  %v890_v51 = vadd.f32 %v889_v34, %v648_v20  ;;  %v902_v52 = vadd.f32 %v901_v16, %v633_v13  ;;  %v953_v41 = vadd.f32 %v952_v14, %v621_v56 }
  0xba   : > { %v915_v53 = vadd.f32 %v914_v25, %v634_v22  ;;  %v928_v31 = vadd.f32 %v927_v39, %v635_v23  ;;  %v941_v55 = vadd.f32 %v940_v24, %v636_v19  ;;  %v966_v42 = vadd.f32 %v965_v32, %v622_v10  ;;  %v543_v24 = vld [vmem:[%s3097_s1 + $0x440] sm:$0xff]  ;;  %v544_v32 = vld [vmem:[%s3097_s1 + $0x448] sm:$0xff] }
  0xbb   : > { %v878_v47 = vrot.slane %v877_v29, 4  ;;  %v891_v48 = vrot.slane %v890_v51, 4  ;;  %v903_v44 = vadd.f32 %v902_v52, %v649_v43  ;;  %v954_v2 = vadd.f32 %v953_v41, %v637_v40  ;;  %v559_v52 = vld [vmem:[%s3097_s1 + $0x4c0] sm:$0xff]  ;;  %v560_v41 = vld [vmem:[%s3097_s1 + $0x4c8] sm:$0xff] }
  0xbc   : > { %v916_v37 = vadd.f32 %v915_v53, %v650_v26  ;;  %v929_v45 = vadd.f32 %v928_v31, %v651_v21  ;;  %v942_v30 = vadd.f32 %v941_v55, %v652_v28  ;;  %v967_v11 = vadd.f32 %v966_v42, %v638_v35 }
  0xbd   : > { %v879_v12 = vadd.f32 %v878_v47, %v877_v29  ;;  %v892_v57 = vadd.f32 %v891_v48, %v890_v51  ;;  %v904_v54 = vrot.slane %v903_v44, 4  ;;  %v955_v15 = vadd.f32 %v954_v2, %v653_v36  ;;  %v545_v51 = vld [vmem:[%s3097_s1 + $0x450] sm:$0xff]  ;;  %v547_v47 = vld [vmem:[%s3097_s1 + $0x460] sm:$0xff]  ;;  %v548_v48 = vld [vmem:[%s3097_s1 + $0x468] sm:$0xff] }
  0xbe   : > { %v917_v13 = vrot.slane %v916_v37, 4  ;;  %v930_v56 = vrot.slane %v929_v45, 4  ;;  %v943_v20 = vrot.slane %v942_v30, 4  ;;  %v968_v6 = vadd.f32 %v967_v11, %v654_v46  ;;  %v561_v36 = vld [vmem:[%s3097_s1 + $0x4d0] sm:$0xff]  ;;  %v546_v46 = vld [vmem:[%s3097_s1 + $0x458] sm:$0xff]  ;;  %v563_v2 = vld [vmem:[%s3097_s1 + $0x4e0] sm:$0xff] }
  0xbf   : > { %v880_v5 = vrot.slane %v879_v12, 2  ;;  %v893_v10 = vrot.slane %v892_v57, 2  ;;  %v905_v7 = vadd.f32 %v904_v54, %v903_v44  ;;  %v956_v0 = vrot.slane %v955_v15, 4  ;;  %v562_v44 = vld [vmem:[%s3097_s1 + $0x4d8] sm:$0xff]  ;;  %v565_v54 = vld [vmem:[%s3097_s1 + $0x4f0] sm:$0xff] }
  0xc0   : > { %v918_v22 = vadd.f32 %v917_v13, %v916_v37  ;;  %v931_v23 = vadd.f32 %v930_v56, %v929_v45  ;;  %v944_v19 = vadd.f32 %v943_v20, %v942_v30  ;;  %v969_v38 = vrot.slane %v968_v6, 4  ;;  %v564_v37 = vld [vmem:[%s3097_s1 + $0x4e8] sm:$0xff]  ;;  %v577_v56 = vld [vmem:[%s3097_s1 + $0x550] sm:$0xff] }
  0xc1   : > { %v881_v34 = vadd.f32 %v880_v5, %v879_v12  ;;  %v894_v16 = vadd.f32 %v893_v10, %v892_v57  ;;  %v906_v14 = vrot.slane %v905_v7, 2  ;;  %v957_v40 = vadd.f32 %v956_v0, %v955_v15  ;;  %v549_v57 = vld [vmem:[%s3097_s1 + $0x470] sm:$0xff]  ;;  %v575_v15 = vld [vmem:[%s3097_s1 + $0x540] sm:$0xff]  ;;  %v576_v13 = vld [vmem:[%s3097_s1 + $0x548] sm:$0xff] }
  0xc2   : > { %v919_v35 = vrot.slane %v918_v22, 2  ;;  %v932_v43 = vrot.slane %v931_v23, 2  ;;  %v945_v25 = vrot.slane %v944_v19, 2  ;;  %v970_v39 = vadd.f32 %v969_v38, %v968_v6  ;;  %v566_v10 = vld [vmem:[%s3097_s1 + $0x4f8] sm:$0xff]  ;;  %v579_v0 = vld [vmem:[%s3097_s1 + $0x560] sm:$0xff] }
  0xc3   : > { %v882_v26 = vrot.slane %v881_v34, 1  ;;  %v895_v21 = vrot.slane %v894_v16, 1  ;;  %v907_v28 = vadd.f32 %v906_v14, %v905_v7  ;;  %v958_v29 = vrot.slane %v957_v40, 2  ;;  %v578_v7 = vld [vmem:[%s3097_s1 + $0x558] sm:$0xff]  ;;  %v581_v14 = vld [vmem:[%s3097_s1 + $0x570] sm:$0xff] }
  0xc4   : > { %v920_v53 = vadd.f32 %v919_v35, %v918_v22  ;;  %v933_v31 = vadd.f32 %v932_v43, %v931_v23  ;;  %v946_v55 = vadd.f32 %v945_v25, %v944_v19  ;;  %v971_v42 = vrot.slane %v970_v39, 2  ;;  %v580_v22 = vld [vmem:[%s3097_s1 + $0x568] sm:$0xff]  ;;  %v593_v43 = vld [vmem:[%s3097_s1 + $0x5d0] sm:$0xff] }
  0xc5   : > { %v3382_v45 = vadd.f32 %v869_v8, %v3305_v49  ;;  %v3384_v30 = vadd.f32 %v882_v26, %v881_v34  ;;  %v908_v11 = vrot.slane %v907_v28, 1  ;;  %v959_v12 = vadd.f32 %v958_v29, %v957_v40  ;;  %v550_v8 = vld [vmem:[%s3097_s1 + $0x478] sm:$0xff]  ;;  %v591_v40 = vld [vmem:[%s3097_s1 + $0x5c0] sm:$0xff]  ;;  %v592_v35 = vld [vmem:[%s3097_s1 + $0x5c8] sm:$0xff] }
  0xc6   : > { %v921_v20 = vrot.slane %v920_v53, 1  ;;  %v934_v6 = vrot.slane %v933_v31, 1  ;;  %v947_v5 = vrot.slane %v946_v55, 1  ;;  %v3391_v49 = vadd.f32 %v971_v42, %v970_v39 }
  0xc7   : > { %v3398_v23 = vadd.f32 %v895_v21, %v894_v16  ;;  %v960_v19 = vrot.slane %v959_v12, 1  ;;  %v975_v38 = vadd.f32 %v559_v52, %v543_v24  ;;  %v988_v34 = vadd.f32 %v560_v41, %v544_v32  ;;  %v582_v16 = vld [vmem:[%s3097_s1 + $0x578] sm:$0xff]  ;;  %v595_v32 = vld [vmem:[%s3097_s1 + $0x5e0] sm:$0xff]  ;;  %v596_v21 = vld [vmem:[%s3097_s1 + $0x5e8] sm:$0xff] }
  0xc8   : > { %v3404_v25 = vadd.f32 %v908_v11, %v907_v28  ;;  %v3406_v39 = vadd.f32 %v921_v20, %v920_v53  ;;  %v3408_v26 = vadd.f32 %v934_v6, %v933_v31  ;;  %v3410_v29 = vadd.f32 %v947_v5, %v946_v55  ;;  %v594_v24 = vld [vmem:[%s3097_s1 + $0x5d8] sm:$0xff]  ;;  %v597_v11 = vld [vmem:[%s3097_s1 + $0x5f0] sm:$0xff]  ;;  %v607_v53 = vld [vmem:[%s3097_s1 + $0x640] sm:$0xff] }
  0xc9   : > { %v976_v41 = vadd.f32 %v975_v38, %v575_v15  ;;  %v989_v42 = vadd.f32 %v988_v34, %v576_v13  ;;  %v1001_v28 = vadd.f32 %v561_v36, %v545_v51  ;;  %v608_v31 = vld [vmem:[%s3097_s1 + $0x648] sm:$0xff]  ;;  %v609_v55 = vld [vmem:[%s3097_s1 + $0x650] sm:$0xff]  ;;  %v3421_v20 = vadd.f32 %v960_v19, %v959_v12  ;;  %v611_v15 = vld [vmem:[%s3097_s1 + $0x660] sm:$0xff] }
  0xca   : > { %4260 = vst [vmem:[#allocation23_spill] sm:$0xff] %v3406_v39  ;;  %v1014_v6 = vadd.f32 %v562_v44, %v546_v46  ;;  %v1027_v5 = vadd.f32 %v563_v2, %v547_v47  ;;  %v610_v39 = vld [vmem:[%s3097_s1 + $0x658] sm:$0xff]  ;;  %v612_v13 = vld [vmem:[%s3097_s1 + $0x668] sm:$0xff]  ;;  %v1053_v34 = vadd.f32 %v565_v54, %v549_v57  ;;  %v613_v52 = vld [vmem:[%s3097_s1 + $0x670] sm:$0xff]  ;;  %v1066_v44 = vadd.f32 %v566_v10, %v550_v8 }
  0xcb   : > { %4261 = vst [vmem:[#allocation24_spill] sm:$0xff] %v3408_v26  ;;  %v598_v26 = vld [vmem:[%s3097_s1 + $0x5f8] sm:$0xff]  ;;  %v977_v51 = vadd.f32 %v976_v41, %v591_v40  ;;  %v990_v36 = vadd.f32 %v989_v42, %v592_v35  ;;  %v1002_v38 = vadd.f32 %v1001_v28, %v577_v56  ;;  %v623_v12 = vld [vmem:[%s3097_s1 + $0x6c0] sm:$0xff]  ;;  %v624_v19 = vld [vmem:[%s3097_s1 + $0x6c8] sm:$0xff] }
  0xcc   : > { %4262 = vst [vmem:[#allocation25_spill] sm:$0xff] %v3410_v29  ;;  %v1040_v29 = vadd.f32 %v564_v37, %v548_v48  ;;  %v1015_v46 = vadd.f32 %v1014_v6, %v578_v7  ;;  %v1028_v47 = vadd.f32 %v1027_v5, %v579_v0  ;;  %v614_v2 = vld [vmem:[%s3097_s1 + $0x678] sm:$0xff]  ;;  %v625_v37 = vld [vmem:[%s3097_s1 + $0x6d0] sm:$0xff]  ;;  %v1054_v57 = vadd.f32 %v1053_v34, %v581_v14  ;;  %v627_v54 = vld [vmem:[%s3097_s1 + $0x6e0] sm:$0xff] }
  0xcd   : > { %4263 = vst [vmem:[#allocation26_spill] sm:$0xff] %v3421_v20  ;;  %v626_v20 = vld [vmem:[%s3097_s1 + $0x6d8] sm:$0xff]  ;;  %v978_v40 = vadd.f32 %v977_v51, %v607_v53  ;;  %v991_v35 = vadd.f32 %v990_v36, %v608_v31  ;;  %v1003_v56 = vadd.f32 %v1002_v38, %v593_v43  ;;  %v639_v41 = vld [vmem:[%s3097_s1 + $0x740] sm:$0xff]  ;;  %v640_v42 = vld [vmem:[%s3097_s1 + $0x748] sm:$0xff]  ;;  %v1067_v8 = vadd.f32 %v1066_v44, %v582_v16 }
  0xce   : > { %v1041_v48 = vadd.f32 %v1040_v29, %v580_v22  ;;  %v1016_v7 = vadd.f32 %v1015_v46, %v594_v24  ;;  %v1029_v0 = vadd.f32 %v1028_v47, %v595_v32  ;;  %v628_v10 = vld [vmem:[%s3097_s1 + $0x6e8] sm:$0xff]  ;;  %v629_v29 = vld [vmem:[%s3097_s1 + $0x6f0] sm:$0xff]  ;;  %v630_v28 = vld [vmem:[%s3097_s1 + $0x6f8] sm:$0xff]  ;;  %v1055_v14 = vadd.f32 %v1054_v57, %v597_v11 }
  0xcf   : > { %v979_v53 = vadd.f32 %v978_v40, %v623_v12  ;;  %v992_v31 = vadd.f32 %v991_v35, %v624_v19  ;;  %v1004_v43 = vadd.f32 %v1003_v56, %v609_v55  ;;  %v641_v6 = vld [vmem:[%s3097_s1 + $0x750] sm:$0xff]  ;;  %v655_v5 = vld [vmem:[%s3097_s1 + $0x7c0] sm:$0xff]  ;;  %v656_v51 = vld [vmem:[%s3097_s1 + $0x7c8] sm:$0xff]  ;;  %v1068_v16 = vadd.f32 %v1067_v8, %v598_v26 }
  0xd0   : > { %v1042_v22 = vadd.f32 %v1041_v48, %v596_v21  ;;  %v1017_v24 = vadd.f32 %v1016_v7, %v610_v39  ;;  %v1030_v32 = vadd.f32 %v1029_v0, %v611_v15  ;;  %v642_v36 = vld [vmem:[%s3097_s1 + $0x758] sm:$0xff]  ;;  %v643_v38 = vld [vmem:[%s3097_s1 + $0x760] sm:$0xff]  ;;  %v644_v34 = vld [vmem:[%s3097_s1 + $0x768] sm:$0xff]  ;;  %v1056_v11 = vadd.f32 %v1055_v14, %v613_v52 }
  0xd1   : > { %v980_v12 = vadd.f32 %v979_v53, %v639_v41  ;;  %v993_v19 = vadd.f32 %v992_v31, %v640_v42  ;;  %v1005_v55 = vadd.f32 %v1004_v43, %v625_v37  ;;  %v645_v46 = vld [vmem:[%s3097_s1 + $0x770] sm:$0xff]  ;;  %v646_v47 = vld [vmem:[%s3097_s1 + $0x778] sm:$0xff]  ;;  %v659_v26 = vld [vmem:[%s3097_s1 + $0x7e0] sm:$0xff] }
  0xd2   : > { %v1043_v21 = vadd.f32 %v1042_v22, %v612_v13  ;;  %v657_v48 = vld [vmem:[%s3097_s1 + $0x7d0] sm:$0xff]  ;;  %v1018_v44 = vadd.f32 %v1017_v24, %v626_v20  ;;  %v1031_v39 = vadd.f32 %v1030_v32, %v627_v54  ;;  %v1069_v13 = vadd.f32 %v1068_v16, %v614_v2  ;;  %v658_v40 = vld [vmem:[%s3097_s1 + $0x7d8] sm:$0xff]  ;;  %v660_v35 = vld [vmem:[%s3097_s1 + $0x7e8] sm:$0xff] }
  0xd3   : > { %v981_v56 = vadd.f32 %v980_v12, %v655_v5  ;;  %v994_v57 = vadd.f32 %v993_v19, %v656_v51  ;;  %v1006_v7 = vadd.f32 %v1005_v55, %v641_v6  ;;  %v1057_v0 = vadd.f32 %v1056_v11, %v629_v29  ;;  %v661_v41 = vld [vmem:[%s3097_s1 + $0x7f0] sm:$0xff]  ;;  %v662_v8 = vld [vmem:[%s3097_s1 + $0x7f8] sm:$0xff] }
  0xd4   : > { %v1044_v15 = vadd.f32 %v1043_v21, %v628_v10  ;;  %v1019_v42 = vadd.f32 %v1018_v44, %v642_v36  ;;  %v1032_v37 = vadd.f32 %v1031_v39, %v643_v38  ;;  %v1070_v52 = vadd.f32 %v1069_v13, %v630_v28 }
  0xd5   : > { %v982_v53 = vrot.slane %v981_v56, 4  ;;  %v995_v31 = vrot.slane %v994_v57, 4  ;;  %v1007_v20 = vadd.f32 %v1006_v7, %v657_v48  ;;  %v1058_v43 = vadd.f32 %v1057_v0, %v645_v46 }
  0xd6   : > { %v1045_v22 = vadd.f32 %v1044_v15, %v644_v34  ;;  %v1020_v54 = vadd.f32 %v1019_v42, %v658_v40  ;;  %v1033_v10 = vadd.f32 %v1032_v37, %v659_v26  ;;  %v1071_v14 = vadd.f32 %v1070_v52, %v646_v47 }
  0xd7   : > { %v983_v24 = vadd.f32 %v982_v53, %v981_v56  ;;  %v996_v32 = vadd.f32 %v995_v31, %v994_v57  ;;  %v1008_v5 = vrot.slane %v1007_v20, 4  ;;  %v1059_v51 = vadd.f32 %v1058_v43, %v661_v41 }
  0xd8   : > { %v1046_v2 = vadd.f32 %v1045_v22, %v660_v35  ;;  %v1021_v6 = vrot.slane %v1020_v54, 4  ;;  %v1034_v29 = vrot.slane %v1033_v10, 4  ;;  %v1072_v16 = vadd.f32 %v1071_v14, %v662_v8 }
  0xd9   : > { %v984_v36 = vrot.slane %v983_v24, 2  ;;  %v997_v38 = vrot.slane %v996_v32, 2  ;;  %v1009_v28 = vadd.f32 %v1008_v5, %v1007_v20  ;;  %v1060_v34 = vrot.slane %v1059_v51, 4 }
  0xda   : > { %v1047_v21 = vrot.slane %v1046_v2, 4  ;;  %v1022_v12 = vadd.f32 %v1021_v6, %v1020_v54  ;;  %v1035_v19 = vadd.f32 %v1034_v29, %v1033_v10  ;;  %v1073_v11 = vrot.slane %v1072_v16, 4 }
  0xdb   : > { %v985_v46 = vadd.f32 %v984_v36, %v983_v24  ;;  %v998_v48 = vadd.f32 %v997_v38, %v996_v32  ;;  %v1010_v44 = vrot.slane %v1009_v28, 2  ;;  %v1061_v47 = vadd.f32 %v1060_v34, %v1059_v51 }
  0xdc   : > { %v1048_v55 = vadd.f32 %v1047_v21, %v1046_v2  ;;  %v1023_v39 = vrot.slane %v1022_v12, 2  ;;  %v1036_v15 = vrot.slane %v1035_v19, 2  ;;  %v1074_v40 = vadd.f32 %v1073_v11, %v1072_v16 }
  0xdd   : > { %v986_v26 = vrot.slane %v985_v46, 1  ;;  %v999_v35 = vrot.slane %v998_v48, 1  ;;  %v1011_v56 = vadd.f32 %v1010_v44, %v1009_v28  ;;  %v1062_v57 = vrot.slane %v1061_v47, 2 }
  0xde   : > { %v1049_v13 = vrot.slane %v1048_v55, 2  ;;  %v1024_v7 = vadd.f32 %v1023_v39, %v1022_v12  ;;  %v1037_v0 = vadd.f32 %v1036_v15, %v1035_v19  ;;  %v1075_v42 = vrot.slane %v1074_v40, 2 }
  0xdf   : > { %v4264_v37 = vrot.slane %v3391_v49, 1  ;;  %v987_v52 = vadd.f32 %v986_v26, %v985_v46  ;;  %v1012_v8 = vrot.slane %v1011_v56, 1  ;;  %v1063_v53 = vadd.f32 %v1062_v57, %v1061_v47 }
  0xe0   : > { %v1050_v41 = vadd.f32 %v1049_v13, %v1048_v55  ;;  %v1025_v31 = vrot.slane %v1024_v7, 1  ;;  %v1038_v20 = vrot.slane %v1037_v0, 1  ;;  %v1076_v54 = vadd.f32 %v1075_v42, %v1074_v40  ;;  %v1112_v13 = vld [vmem:[%s3107_s17 + $0x8] sm:$0xff] }
  0xe1   : > { %v974_v22 = vadd.f32 %v4264_v37, %v3391_v49  ;;  %v1000_v10 = vadd.f32 %v999_v35, %v998_v48  ;;  %v1013_v2 = vadd.f32 %v1012_v8, %v1011_v56  ;;  %v1064_v14 = vrot.slane %v1063_v53, 1 }
  0xe2   : > { %v1051_v43 = vrot.slane %v1050_v41, 1  ;;  %v3457_v24 = vmul.f32 0.015625, %v3243_v17  ;;  %v1026_v32 = vadd.f32 %v1025_v31, %v1024_v7  ;;  %v1039_v5 = vadd.f32 %v1038_v20, %v1037_v0 }
  0xe3   : > { %v1077_v51 = vrot.slane %v1076_v54, 1  ;;  %v3460_v6 = vmul.f32 0.015625, %v3216_v59  ;;  %v1065_v29 = vadd.f32 %v1064_v14, %v1063_v53  ;;  %v3463_v21 = vmul.f32 0.015625, %v3218_v60 }
  0xe4   : > { %4265 = vst [vmem:[#allocation27_spill] sm:$0xff] %v3457_v24  ;;  %v1052_v49 = vadd.f32 %v1051_v43, %v1050_v41  ;;  %v3466_v16 = vmul.f32 0.015625, %v3224_v1  ;;  %v3469_v38 = vmul.f32 0.015625, %v3296_v27  ;;  %v3472_v17 = vmul.f32 0.015625, %v3227_v3 }
  0xe5   : > { %v1078_v36 = vadd.f32 %v1077_v51, %v1076_v54  ;;  %v3475_v28 = vmul.f32 0.015625, %v3229_v4  ;;  %v3478_v59 = vmul.f32 0.015625, %v3235_v9  ;;  %v3481_v60 = vmul.f32 0.015625, %v3318_v58 }
  0xe6   : > { %4266 = vst [vmem:[#allocation28_spill] sm:$0xff] %v3469_v38  ;;  %v3484_v1 = vmul.f32 0.015625, %v3298_v33  ;;  %v3487_v34 = vmul.f32 0.015625, %v3312_v50  ;;  %v3490_v27 = vmul.f32 0.015625, %v3320_v61  ;;  %v3493_v3 = vmul.f32 0.015625, %v3322_v62  ;;  %v4278_v62 = vld [vmem:[#allocation23_spill] sm:$0xff] }
  0xe7   : > { %4267 = vst [vmem:[#allocation29_spill] sm:$0xff] %v3481_v60  ;;  %v3496_v4 = vmul.f32 0.015625, %v3324_v63  ;;  %v3499_v9 = vmul.f32 0.015625, %v3335_v18  ;;  %v3502_v58 = vmul.f32 0.015625, %v3382_v45  ;;  %v3505_v33 = vmul.f32 0.015625, %v3384_v30  ;;  %v4280_v63 = vld [vmem:[#allocation24_spill] sm:$0xff] }
  0xe8   : > { %4268 = vst [vmem:[#allocation30_spill] sm:$0xff] %v3484_v1  ;;  %v3508_v50 = vmul.f32 0.015625, %v3398_v23  ;;  %v3511_v61 = vmul.f32 0.015625, %v3404_v25  ;;  %v3514_v12 = vmul.f32 0.015625, %v4278_v62  ;;  %v3517_v19 = vmul.f32 0.015625, %v4280_v63  ;;  %v4282_v18 = vld [vmem:[#allocation25_spill] sm:$0xff] }
  0xe9   : > { %4269 = vst [vmem:[#allocation31_spill] sm:$0xff] %v3487_v34  ;;  %v3520_v55 = vmul.f32 0.015625, %v4282_v18  ;;  %v4284_v45 = vld [vmem:[#allocation26_spill] sm:$0xff]  ;;  %v3526_v46 = vmul.f32 0.015625, %v974_v22  ;;  %v3528_v23 = vmul.f32 0.015625, %v987_v52  ;;  %v3530_v48 = vmul.f32 0.015625, %v1000_v10 }
  0xea   : > { %4270 = vst [vmem:[#allocation32_spill] sm:$0xff] %v3490_v27  ;;  %v3523_v11 = vmul.f32 0.015625, %v4284_v45  ;;  %v1111_v30 = vld [vmem:[%s3107_s17] sm:$0xff]  ;;  %v3532_v25 = vmul.f32 0.015625, %v1013_v2  ;;  %v3534_v44 = vmul.f32 0.015625, %v1026_v32  ;;  %v3536_v47 = vmul.f32 0.015625, %v1039_v5 }
  0xeb   : > { %4271 = vst [vmem:[#allocation33_spill] sm:$0xff] %v3493_v3  ;;  %v3538_v39 = vmul.f32 0.015625, %v1052_v49  ;;  %v3540_v15 = vmul.f32 0.015625, %v1065_v29  ;;  %v3543_v40 = vmul.f32 0.015625, %v1078_v36  ;;  %v1115_v26 = vperm.slane %v1111_v30, 0 }
  0xec   : > { %4272 = vst [vmem:[#allocation34_spill] sm:$0xff] %v3496_v4  ;;  %v1116_v35 = vperm.slane %v1111_v30, 1  ;;  %v1117_v56 = vperm.slane %v1111_v30, 2  ;;  %v1118_v57 = vperm.slane %v1111_v30, 3  ;;  %v1119_v7 = vperm.slane %v1111_v30, 4 }
  0xed   : > { %4273 = vst [vmem:[#allocation35_spill] sm:$0xff] %v3499_v9  ;;  %v1120_v0 = vperm.slane %v1111_v30, 5  ;;  %v1121_v41 = vperm.slane %v1111_v30, 6  ;;  %v1122_v42 = vperm.slane %v1111_v30, 7  ;;  %v1123_v37 = vperm.slane %v1112_v13, 0 }
  0xee   : > { %4274 = vst [vmem:[#allocation36_spill] sm:$0xff] %v3502_v58  ;;  %v1124_v22 = vperm.slane %v1112_v13, 1  ;;  %v1125_v52 = vperm.slane %v1112_v13, 2  ;;  %v1126_v8 = vperm.slane %v1112_v13, 3  ;;  %v1127_v53 = vperm.slane %v1112_v13, 4 }
  0xef   : > { %4275 = vst [vmem:[#allocation37_spill] sm:$0xff] %v3505_v33  ;;  %v1128_v31 = vperm.slane %v1112_v13, 5  ;;  %v1129_v20 = vperm.slane %v1112_v13, 6  ;;  %v1130_v43 = vperm.slane %v1112_v13, 7  ;;  %v1147_v54 = vmul.f32 %v1115_v26, %v3457_v24 }
  0xf0   : > { %4276 = vst [vmem:[#allocation38_spill] sm:$0xff] %v3508_v50  ;;  %v1148_v10 = vmul.f32 %v1116_v35, %v3460_v6  ;;  %v1149_v2 = vmul.f32 %v1117_v56, %v3463_v21  ;;  %v1150_v14 = vmul.f32 %v1118_v57, %v3466_v16  ;;  %v1151_v32 = vmul.f32 %v1119_v7, %v3469_v38 }
  0xf1   : > { %4277 = vst [vmem:[#allocation39_spill] sm:$0xff] %v3511_v61  ;;  %v1152_v5 = vmul.f32 %v1120_v0, %v3472_v17  ;;  %v1153_v51 = vmul.f32 %v1121_v41, %v3475_v28  ;;  %v1154_v49 = vmul.f32 %v1122_v42, %v3478_v59  ;;  %v1155_v29 = vmul.f32 %v1123_v37, %v3481_v60 }
  0xf2   : > { %4279 = vst [vmem:[#allocation23_spill] sm:$0xff] %v3514_v12  ;;  %v1156_v36 = vmul.f32 %v1124_v22, %v3484_v1  ;;  %v1157_v62 = vmul.f32 %v1125_v52, %v3487_v34  ;;  %v1158_v63 = vmul.f32 %v1126_v8, %v3490_v27  ;;  %v1159_v18 = vmul.f32 %v1127_v53, %v3493_v3 }
  0xf3   : > { %4281 = vst [vmem:[#allocation24_spill] sm:$0xff] %v3517_v19  ;;  %v1160_v45 = vmul.f32 %v1128_v31, %v3496_v4  ;;  %v1161_v30 = vmul.f32 %v1129_v20, %v3499_v9  ;;  %v1162_v13 = vmul.f32 %v1130_v43, %v3502_v58  ;;  %v1163_v38 = vmul.f32 %v1115_v26, %v3505_v33  ;;  %v1179_v4 = vld [vmem:[%s3114_s27] sm:$0xff] }
  0xf4   : > { %4283 = vst [vmem:[#allocation25_spill] sm:$0xff] %v3520_v55  ;;  %v1164_v24 = vmul.f32 %v1116_v35, %v3508_v50  ;;  %v1165_v60 = vmul.f32 %v1117_v56, %v3511_v61  ;;  %v1166_v1 = vmul.f32 %v1118_v57, %v3514_v12  ;;  %v1167_v34 = vmul.f32 %v1119_v7, %v3517_v19 }
  0xf5   : > { %4285 = vst [vmem:[#allocation26_spill] sm:$0xff] %v3523_v11  ;;  %v1168_v27 = vmul.f32 %v1120_v0, %v3520_v55  ;;  %v1169_v3 = vmul.f32 %v1121_v41, %v3523_v11  ;;  %v1170_v9 = vmul.f32 %v1122_v42, %v3526_v46  ;;  %v1171_v58 = vmul.f32 %v1123_v37, %v3528_v23  ;;  %v3578_v0 = vld [vmem:[%s3114_s27 + $0x8] sm:$0xff] }
  0xf6   : > { %4286 = vst [vmem:[#allocation40_spill] sm:$0xff] %v3526_v46  ;;  %v1172_v26 = vmul.f32 %v1124_v22, %v3530_v48  ;;  %v1173_v33 = vmul.f32 %v1125_v52, %v3532_v25  ;;  %v1174_v35 = vmul.f32 %v1126_v8, %v3534_v44  ;;  %v1175_v56 = vmul.f32 %v1127_v53, %v3536_v47 }
  0xf7   : > { %4287 = vst [vmem:[#allocation41_spill] sm:$0xff] %v3528_v23  ;;  %v1176_v57 = vmul.f32 %v1128_v31, %v3538_v39  ;;  %v1177_v7 = vmul.f32 %v1129_v20, %v3540_v15  ;;  %v3581_v41 = vmul.f32 %v1130_v43, %v3543_v40  ;;  %v1183_v42 = vperm.slane %v1179_v4, 0 }
  0xf8   : > { %4288 = vst [vmem:[#allocation42_spill] sm:$0xff] %v3530_v48  ;;  %v1184_v19 = vperm.slane %v1179_v4, 1  ;;  %v1185_v37 = vperm.slane %v1179_v4, 2  ;;  %v1186_v23 = vperm.slane %v1179_v4, 3  ;;  %v1187_v22 = vperm.slane %v1179_v4, 4 }
  0xf9   : > { %4289 = vst [vmem:[#allocation43_spill] sm:$0xff] %v3532_v25  ;;  %v1188_v48 = vperm.slane %v1179_v4, 5  ;;  %v1189_v52 = vperm.slane %v1179_v4, 6  ;;  %v1190_v25 = vperm.slane %v1179_v4, 7  ;;  %v1191_v8 = vperm.slane %v3578_v0, 0 }
  0xfa   : > { %4290 = vst [vmem:[#allocation44_spill] sm:$0xff] %v3534_v44  ;;  %v1192_v53 = vperm.slane %v3578_v0, 1  ;;  %v1193_v31 = vperm.slane %v3578_v0, 2  ;;  %v1194_v20 = vperm.slane %v3578_v0, 3  ;;  %v1196_v43 = vperm.slane %v3578_v0, 5 }
  0xfb   : > { %4291 = vst [vmem:[#allocation45_spill] sm:$0xff] %v3536_v47  ;;  %v1195_v47 = vperm.slane %v3578_v0, 4  ;;  %v3595_v4 = vadd.f32 %v1185_v37, %v1149_v2  ;;  %v3597_v44 = vadd.f32 %v1186_v23, %v1150_v14  ;;  %v3599_v46 = vadd.f32 %v1187_v22, %v1151_v32 }
  0xfc   : > { %4292 = vst [vmem:[#allocation46_spill] sm:$0xff] %v3538_v39  ;;  %v3593_v39 = vadd.f32 %v1184_v19, %v1148_v10  ;;  %v3601_v11 = vadd.f32 %v1188_v48, %v1152_v5  ;;  %v3603_v55 = vadd.f32 %v1189_v52, %v1153_v51  ;;  %v3605_v12 = vadd.f32 %v1190_v25, %v1154_v49 }
  0xfd   : > { %4293 = vst [vmem:[#allocation47_spill] sm:$0xff] %v3540_v15  ;;  %v3591_v15 = vadd.f32 %v1183_v42, %v1147_v54  ;;  %v3607_v61 = vadd.f32 %v1191_v8, %v1155_v29  ;;  %v3609_v50 = vadd.f32 %v1192_v53, %v1156_v36  ;;  %v3611_v54 = vadd.f32 %v1193_v31, %v1157_v62 }
  0xfe   : > { %4294 = vst [vmem:[#allocation48_spill] sm:$0xff] %v3543_v40  ;;  %v4245_v40 = vperm.slane %v3578_v0, 7  ;;  %v3613_v10 = vadd.f32 %v1194_v20, %v1158_v63  ;;  %v3615_v2 = vadd.f32 %v1195_v47, %v1159_v18  ;;  %v3617_v14 = vadd.f32 %v1196_v43, %v1160_v45 }
  0xff   : > { %4295 = vst [vmem:[#allocation49_spill] sm:$0xff] %v3581_v41  ;;  %v1197_v41 = vperm.slane %v3578_v0, 6  ;;  %v3625_v51 = vadd.f32 %v1183_v42, %v1163_v38  ;;  %v3627_v49 = vadd.f32 %v1184_v19, %v1164_v24  ;;  %v3629_v29 = vadd.f32 %v1185_v37, %v1165_v60  ;;  %v4306_v42 = vld [vmem:[#allocation38_spill] sm:$0xff]  ;;  %v4307_v37 = vld [vmem:[#allocation39_spill] sm:$0xff] }
 0x100   : > { %v3623_v5 = vadd.f32 %v4245_v40, %v1162_v13  ;;  %v3631_v36 = vadd.f32 %v1186_v23, %v1166_v1  ;;  %v3633_v62 = vadd.f32 %v1187_v22, %v1167_v34  ;;  %v3635_v63 = vadd.f32 %v1188_v48, %v1168_v27  ;;  %v4300_v23 = vld [vmem:[#allocation30_spill] sm:$0xff]  ;;  %v4308_v22 = vld [vmem:[#allocation23_spill] sm:$0xff] }
 0x101   : > { %v3619_v32 = vadd.f32 %v1197_v41, %v1161_v30  ;;  %4296 = vst [vmem:[#allocation50_spill] sm:$0xff] %v3625_v51  ;;  %v3637_v18 = vadd.f32 %v1189_v52, %v1169_v3  ;;  %v3639_v45 = vadd.f32 %v1190_v25, %v1170_v9  ;;  %v3641_v30 = vadd.f32 %v1191_v8, %v1171_v58  ;;  %v4301_v25 = vld [vmem:[#allocation31_spill] sm:$0xff]  ;;  %v4309_v52 = vld [vmem:[#allocation25_spill] sm:$0xff]  ;;  %v4310_v8 = vld [vmem:[#allocation26_spill] sm:$0xff] }
 0x102   : > { %4297 = vst [vmem:[#allocation51_spill] sm:$0xff] %v3633_v62  ;;  %v3643_v13 = vadd.f32 %v1192_v53, %v1172_v26  ;;  %v3645_v38 = vadd.f32 %v1193_v31, %v1173_v33  ;;  %v3647_v24 = vadd.f32 %v1194_v20, %v1174_v35  ;;  %v3649_v60 = vadd.f32 %v1195_v47, %v1175_v56  ;;  %v4302_v26 = vld [vmem:[#allocation32_spill] sm:$0xff]  ;;  %v4303_v56 = vld [vmem:[#allocation34_spill] sm:$0xff] }
 0x103   : > { %4298 = vst [vmem:[#allocation52_spill] sm:$0xff] %v3641_v30  ;;  %v3651_v1 = vadd.f32 %v1196_v43, %v1176_v57  ;;  %v3653_v34 = vadd.f32 %v1197_v41, %v1177_v7  ;;  %v1279_v27 = vrot.slane %v3460_v6, 6  ;;  %v1280_v3 = vrot.slane %v3463_v21, 4  ;;  %v4304_v7 = vld [vmem:[#allocation35_spill] sm:$0xff]  ;;  %v4305_v41 = vld [vmem:[#allocation36_spill] sm:$0xff]  ;;  %v4312_v43 = vld [vmem:[#allocation42_spill] sm:$0xff] }
 0x104   : > { %4299 = vst [vmem:[#allocation53_spill] sm:$0xff] %v3649_v60  ;;  %v1281_v9 = vrot.slane %v3466_v16, 2  ;;  %v1282_v58 = vrot.slane %v3472_v17, 6  ;;  %v1283_v19 = vrot.slane %v3475_v28, 4  ;;  %v1284_v33 = vrot.slane %v3478_v59, 2  ;;  %v4311_v31 = vld [vmem:[#allocation40_spill] sm:$0xff] }
 0x105   : > { %v1285_v48 = vrot.slane %v4300_v23, 6  ;;  %v1286_v47 = vrot.slane %v4301_v25, 4  ;;  %v1287_v35 = vrot.slane %v4302_v26, 2  ;;  %v1288_v57 = vrot.slane %v4303_v56, 6  ;;  %v4313_v25 = vld [vmem:[#allocation43_spill] sm:$0xff]  ;;  %v4314_v56 = vld [vmem:[#allocation44_spill] sm:$0xff] }
 0x106   : > { %v1289_v6 = vrot.slane %v4304_v7, 4  ;;  %v1290_v21 = vrot.slane %v4305_v41, 2  ;;  %v1291_v16 = vrot.slane %v4306_v42, 6  ;;  %v1292_v17 = vrot.slane %v4307_v37, 4  ;;  %v4315_v40 = vld [vmem:[#allocation46_spill] sm:$0xff]  ;;  %v4316_v60 = vld [vmem:[#allocation47_spill] sm:$0xff] }
 0x107   : > { %v1293_v28 = vrot.slane %v4308_v22, 2  ;;  %v1294_v59 = vrot.slane %v4309_v52, 6  ;;  %v1295_v53 = vrot.slane %v4310_v8, 4  ;;  %v1296_v20 = vrot.slane %v4311_v31, 2  ;;  %v4317_v30 = vld [vmem:[#allocation48_spill] sm:$0xff]  ;;  %v4318_v22 = vld [vmem:[#allocation27_spill] sm:$0xff] }
 0x108   : > { %v1297_v23 = vrot.slane %v4312_v43, 6  ;;  %v1298_v26 = vrot.slane %v4313_v25, 4  ;;  %v1299_v7 = vrot.slane %v4314_v56, 2  ;;  %v1300_v41 = vrot.slane %v4315_v40, 6  ;;  %v4319_v31 = vld [vmem:[#allocation28_spill] sm:$0xff] }
 0x109   : > { %v1301_v42 = vrot.slane %v4316_v60, 4  ;;  %v1302_v37 = vrot.slane %v4317_v30, 2  ;;  %v1304_v52 = vsel %vm1303_vm0, %v4318_v22, %v1279_v27  ;;  %v1306_v8 = vsel %vm1305_vm1, %v1280_v3, %v1281_v9  ;;  %v4320_v30 = vld [vmem:[#allocation29_spill] sm:$0xff] }
 0x10a   : > { %v1309_v43 = vsel %vm1303_vm0, %v4319_v31, %v1282_v58  ;;  %v1310_v25 = vsel %vm1305_vm1, %v1283_v19, %v1284_v33  ;;  %v1308_v40 = vsel %vm1307_vm2, %v1304_v52, %v1306_v8  ;;  %v1312_v56 = vsel %vm1303_vm0, %v4320_v30, %v1285_v48  ;;  %v4321_v27 = vld [vmem:[#allocation33_spill] sm:$0xff]  ;;  %v4323_v52 = vld [vmem:[#allocation24_spill] sm:$0xff] }
 0x10b   : > { %v1311_v60 = vsel %vm1307_vm2, %v1309_v43, %v1310_v25  ;;  %v1313_v62 = vsel %vm1305_vm1, %v1286_v47, %v1287_v35  ;;  %v1315_v3 = vsel %vm1303_vm0, %v4321_v27, %v1288_v57  ;;  %v1316_v9 = vsel %vm1305_vm1, %v1289_v6, %v1290_v21  ;;  %v4322_v58 = vld [vmem:[#allocation37_spill] sm:$0xff] }
 0x10c   : > { %v1314_v51 = vsel %vm1307_vm2, %v1312_v56, %v1313_v62  ;;  %v1318_v19 = vsel %vm1303_vm0, %v4322_v58, %v1291_v16  ;;  %v1317_v33 = vsel %vm1307_vm2, %v1315_v3, %v1316_v9  ;;  %v1319_v22 = vsel %vm1305_vm1, %v1292_v17, %v1293_v28  ;;  %v4324_v35 = vld [vmem:[#allocation41_spill] sm:$0xff] }
 0x10d   : > { %v1321_v8 = vsel %vm1303_vm0, %v4323_v52, %v1294_v59  ;;  %v1322_v48 = vsel %vm1305_vm1, %v1295_v53, %v1296_v20  ;;  %v1320_v47 = vsel %vm1307_vm2, %v1318_v19, %v1319_v22  ;;  %v1324_v57 = vsel %vm1303_vm0, %v4324_v35, %v1297_v23  ;;  %v4325_v16 = vld [vmem:[#allocation45_spill] sm:$0xff] }
 0x10e   : > { %v1323_v62 = vsel %vm1307_vm2, %v1321_v8, %v1322_v48  ;;  %v1325_v6 = vsel %vm1305_vm1, %v1298_v26, %v1299_v7  ;;  %v1327_v17 = vsel %vm1303_vm0, %v4325_v16, %v1300_v41  ;;  %v1328_v28 = vsel %vm1305_vm1, %v1301_v42, %v1302_v37  ;;  %v4326_v26 = vld [vmem:[#allocation49_spill] sm:$0xff] }
 0x10f   : > { %v1326_v21 = vsel %vm1307_vm2, %v1324_v57, %v1325_v6  ;;  %v1334_v59 = vrot.slane %v1320_v47, 7  ;;  %v1329_v53 = vsel %vm1307_vm2, %v1327_v17, %v1328_v28  ;;  %v1345_v31 = vrot.slane %v1323_v62, 7 }
 0x110   : > { %v1352_v23 = vrot.slane %v1326_v21, 7  ;;  %v1359_v43 = vrot.slane %v1329_v53, 7  ;;  %v4327_v7 = vperm.slane %v3578_v0, 7  ;;  %v1404_v42 = vrot.slane %v3593_v39, 6 }
 0x111   : > { %v1336_v20 = vsel %vm1335_vm3, %v1334_v59, %v1308_v40  ;;  %v1405_v37 = vrot.slane %v3595_v4, 4  ;;  %v1346_v56 = vsel %vm1335_vm3, %v1345_v31, %v1311_v60  ;;  %v1407_v48 = vrot.slane %v3601_v11, 6 }
 0x112   : > { %v3716_v25 = vadd.f32 %v4327_v7, %v4326_v26  ;;  %v1338_v41 = vsel %vm1337_vm4, %v1334_v59, %v1336_v20  ;;  %v1353_v40 = vsel %vm1335_vm3, %v1352_v23, %v1314_v51  ;;  %v1360_v27 = vsel %vm1335_vm3, %v1359_v43, %v1317_v33 }
 0x113   : > { %v1340_v30 = vsel %vm1339_vm5, %v1334_v59, %v1338_v41  ;;  %v1347_v0 = vsel %vm1337_vm4, %v1345_v31, %v1346_v56  ;;  %v1354_v9 = vsel %vm1337_vm4, %v1352_v23, %v1353_v40  ;;  %v1361_v58 = vsel %vm1337_vm4, %v1359_v43, %v1360_v27 }
 0x114   : > { %v1342_v3 = vsel %vm1341_vm6, %v1334_v59, %v1340_v30  ;;  %v1348_v19 = vsel %vm1339_vm5, %v1345_v31, %v1347_v0  ;;  %v1355_v22 = vsel %vm1339_vm5, %v1352_v23, %v1354_v9  ;;  %v1362_v52 = vsel %vm1339_vm5, %v1359_v43, %v1361_v58 }
 0x115   : > { %1368 = vst [vmem:[%s3734_s26] sm:$0xff] %v1342_v3  ;;  %v1406_v51 = vrot.slane %v3597_v44, 2  ;;  %v1349_v60 = vsel %vm1341_vm6, %v1345_v31, %v1348_v19  ;;  %v1356_v33 = vsel %vm1341_vm6, %v1352_v23, %v1355_v22  ;;  %v1363_v8 = vsel %vm1341_vm6, %v1359_v43, %v1362_v52  ;;  %v4328_v52 = vld [vmem:[#allocation50_spill] sm:$0xff] }
 0x116   : > { %1369 = vst [vmem:[%s3734_s26 + $0x8] sm:$0xff] %v1349_v60  ;;  %v1408_v47 = vrot.slane %v3603_v55, 4  ;;  %v1409_v62 = vrot.slane %v3605_v12, 2  ;;  %v1410_v35 = vrot.slane %v3609_v50, 6  ;;  %v1411_v57 = vrot.slane %v3611_v54, 4 }
 0x117   : > { %1370 = vst [vmem:[%s3734_s26 + $0x10] sm:$0xff] %v1356_v33  ;;  %v1412_v6 = vrot.slane %v3613_v10, 2  ;;  %v1413_v21 = vrot.slane %v3617_v14, 6  ;;  %v1414_v16 = vrot.slane %v3619_v32, 4  ;;  %v1415_v17 = vrot.slane %v3623_v5, 2 }
 0x118   : > { %1371 = vst [vmem:[%s3734_s26 + $0x18] sm:$0xff] %v1363_v8  ;;  %v1416_v28 = vrot.slane %v3627_v49, 6  ;;  %v1417_v59 = vrot.slane %v3629_v29, 4  ;;  %v1418_v53 = vrot.slane %v3631_v36, 2  ;;  %v1419_v20 = vrot.slane %v3635_v63, 6 }
 0x119   : > { %v1420_v31 = vrot.slane %v3637_v18, 4  ;;  %v1421_v23 = vrot.slane %v3639_v45, 2  ;;  %v1422_v43 = vrot.slane %v3643_v13, 6  ;;  %v1423_v26 = vrot.slane %v3645_v38, 4 }
 0x11a   : > { %v1424_v7 = vrot.slane %v3647_v24, 2  ;;  %v1425_v41 = vrot.slane %v3651_v1, 6  ;;  %v1426_v30 = vrot.slane %v3653_v34, 4  ;;  %v1428_v56 = vsel %vm1303_vm0, %v3591_v15, %v1404_v42 }
 0x11b   : > { %v1429_v40 = vsel %vm1305_vm1, %v1405_v37, %v1406_v51  ;;  %v1431_v27 = vsel %vm1303_vm0, %v3599_v46, %v1407_v48  ;;  %v1432_v3 = vsel %vm1305_vm1, %v1408_v47, %v1409_v62  ;;  %v1434_v0 = vsel %vm1303_vm0, %v3607_v61, %v1410_v35  ;;  %v4329_v48 = vld [vmem:[#allocation51_spill] sm:$0xff] }
 0x11c   : > { %v1427_v9 = vrot.slane %v3716_v25, 2  ;;  %v1430_v58 = vsel %vm1307_vm2, %v1428_v56, %v1429_v40  ;;  %v1433_v19 = vsel %vm1307_vm2, %v1431_v27, %v1432_v3  ;;  %v1435_v22 = vsel %vm1305_vm1, %v1411_v57, %v1412_v6  ;;  %v4330_v57 = vld [vmem:[#allocation52_spill] sm:$0xff]  ;;  %v4331_v56 = vld [vmem:[#allocation53_spill] sm:$0xff] }
 0x11d   : > { %v1436_v42 = vsel %vm1307_vm2, %v1434_v0, %v1435_v22  ;;  %v1437_v37 = vsel %vm1303_vm0, %v3615_v2, %v1413_v21  ;;  %v1440_v51 = vsel %vm1303_vm0, %v4328_v52, %v1416_v28  ;;  %v1441_v60 = vsel %vm1305_vm1, %v1417_v59, %v1418_v53 }
 0x11e   : > { %v1438_v33 = vsel %vm1305_vm1, %v1414_v16, %v1415_v17  ;;  %v1442_v8 = vsel %vm1307_vm2, %v1440_v51, %v1441_v60  ;;  %v1443_v47 = vsel %vm1303_vm0, %v4329_v48, %v1419_v20  ;;  %v1444_v62 = vsel %vm1305_vm1, %v1420_v31, %v1421_v23 }
 0x11f   : > { %v1445_v35 = vsel %vm1307_vm2, %v1443_v47, %v1444_v62  ;;  %v1446_v6 = vsel %vm1303_vm0, %v4330_v57, %v1422_v43  ;;  %v1447_v21 = vsel %vm1305_vm1, %v1423_v26, %v1424_v7  ;;  %v1449_v28 = vsel %vm1303_vm0, %v4331_v56, %v1425_v41 }
 0x120   : > { %v1448_v59 = vsel %vm1307_vm2, %v1446_v6, %v1447_v21  ;;  %v1450_v16 = vsel %vm1305_vm1, %v1426_v30, %v1427_v9  ;;  %v1454_v17 = vrot.slane %v1442_v8, 7  ;;  %v1461_v53 = vrot.slane %v1445_v35, 7 }
 0x121   : > { %v1439_v20 = vsel %vm1307_vm2, %v1437_v37, %v1438_v33  ;;  %v1451_v31 = vsel %vm1307_vm2, %v1449_v28, %v1450_v16  ;;  %v1468_v23 = vrot.slane %v1448_v59, 7 }
 0x122   : > { %v1455_v40 = vsel %vm1335_vm3, %v1454_v17, %v1430_v58  ;;  %v1462_v43 = vsel %vm1335_vm3, %v1461_v53, %v1433_v19  ;;  %v1475_v26 = vrot.slane %v1451_v31, 7 }
 0x123   : > { %v1456_v7 = vsel %vm1337_vm4, %v1454_v17, %v1455_v40  ;;  %v1463_v41 = vsel %vm1337_vm4, %v1461_v53, %v1462_v43  ;;  %v1469_v27 = vsel %vm1335_vm3, %v1468_v23, %v1436_v42 }
 0x124   : > { %v1457_v30 = vsel %vm1339_vm5, %v1454_v17, %v1456_v7  ;;  %v1464_v3 = vsel %vm1339_vm5, %v1461_v53, %v1463_v41  ;;  %v1470_v0 = vsel %vm1337_vm4, %v1468_v23, %v1469_v27  ;;  %v1476_v9 = vsel %vm1335_vm3, %v1475_v26, %v1439_v20 }
 0x125   : > { %v1458_v58 = vsel %vm1341_vm6, %v1454_v17, %v1457_v30  ;;  %v1465_v19 = vsel %vm1341_vm6, %v1461_v53, %v1464_v3  ;;  %v1471_v22 = vsel %vm1339_vm5, %v1468_v23, %v1470_v0  ;;  %v1477_v37 = vsel %vm1337_vm4, %v1475_v26, %v1476_v9  ;;  %1503 = sbr.rel (%p2426_p1) target bundleno = 504 (0x1f8), region = 56 }
 0x126   : > { %v1472_v52 = vsel %vm1341_vm6, %v1468_v23, %v1471_v22  ;;  %v1478_v42 = vsel %vm1339_vm5, %v1475_v26, %v1477_v37  ;;  %1484 = vst [vmem:[%s3814_s10] sm:$0xff] %v1458_v58 }
 0x127   : > { %v1479_v51 = vsel %vm1341_vm6, %v1475_v26, %v1478_v42  ;;  %1485 = vst [vmem:[%s3814_s10 + $0x8] sm:$0xff] %v1465_v19 }
 0x128   : > { %1486 = vst [vmem:[%s3814_s10 + $0x10] sm:$0xff] %v1472_v52 }
 0x129   : > { %1487 = vst [vmem:[%s3814_s10 + $0x18] sm:$0xff] %v1479_v51 }
 0x12a   : > { %v1551_v60 = vld [vmem:[%s3117_s15 + $0x178] sm:$0xff]  ;;  %v1550_v33 = vld [vmem:[%s3117_s15 + $0x170] sm:$0xff]  ;;  %v1549_v62 = vld [vmem:[%s3117_s15 + $0x168] sm:$0xff] }
 0x12b   : > { %v1567_v8 = vld [vmem:[%s3117_s15 + $0x1f8] sm:$0xff]  ;;  %1620 = vmatpush.msra.mxu2 %v1551_v60  ;;  %v1566_v35 = vld [vmem:[%s3117_s15 + $0x1f0] sm:$0xff]  ;;  %v1565_v21 = vld [vmem:[%s3117_s15 + $0x1e8] sm:$0xff] }
 0x12c   : > { %1640 = vmatpush.msra.mxu3 %v1567_v8  ;;  %v1519_v48 = vld [vmem:[%s3117_s15 + $0x78] sm:$0xff]  ;;  %v1518_v57 = vld [vmem:[%s3117_s15 + $0x70] sm:$0xff]  ;;  %v1517_v56 = vld [vmem:[%s3117_s15 + $0x68] sm:$0xff] }
 0x12d   : > { %v1535_v47 = vld [vmem:[%s3117_s15 + $0xf8] sm:$0xff]  ;;  %1580 = vmatpush.msra.mxu0 %v1519_v48  ;;  %v1534_v6 = vld [vmem:[%s3117_s15 + $0xf0] sm:$0xff]  ;;  %1621 = vmatpush.msra.mxu2 %v1550_v33  ;;  %v1548_v28 = vld [vmem:[%s3117_s15 + $0x160] sm:$0xff] }
 0x12e   : > { %1600 = vmatpush.msra.mxu1 %v1535_v47  ;;  %1641 = vmatpush.msra.mxu3 %v1566_v35  ;;  %v1533_v59 = vld [vmem:[%s3117_s15 + $0xe8] sm:$0xff]  ;;  %v1564_v16 = vld [vmem:[%s3117_s15 + $0x1e0] sm:$0xff]  ;;  %v1547_v20 = vld [vmem:[%s3117_s15 + $0x158] sm:$0xff] }
 0x12f   : > { %1581 = vmatpush.msra.mxu0 %v1518_v57  ;;  %1622 = vmatpush.msra.mxu2 %v1549_v62  ;;  %v1516_v17 = vld [vmem:[%s3117_s15 + $0x60] sm:$0xff]  ;;  %v1563_v31 = vld [vmem:[%s3117_s15 + $0x1d8] sm:$0xff]  ;;  %v1546_v43 = vld [vmem:[%s3117_s15 + $0x150] sm:$0xff] }
 0x130   : > { %1601 = vmatpush.msra.mxu1 %v1534_v6  ;;  %1642 = vmatpush.msra.mxu3 %v1565_v21  ;;  %v1532_v53 = vld [vmem:[%s3117_s15 + $0xe0] sm:$0xff]  ;;  %v1515_v23 = vld [vmem:[%s3117_s15 + $0x58] sm:$0xff]  ;;  %v1562_v26 = vld [vmem:[%s3117_s15 + $0x1d0] sm:$0xff] }
 0x131   : > { %1582 = vmatpush.msra.mxu0 %v1517_v56  ;;  %1623 = vmatpush.msra.mxu2 %v1548_v28  ;;  %v1531_v40 = vld [vmem:[%s3117_s15 + $0xd8] sm:$0xff]  ;;  %v1514_v7 = vld [vmem:[%s3117_s15 + $0x50] sm:$0xff]  ;;  %v1545_v27 = vld [vmem:[%s3117_s15 + $0x148] sm:$0xff] }
 0x132   : > { %1602 = vmatpush.msra.mxu1 %v1533_v59  ;;  %1643 = vmatpush.msra.mxu3 %v1564_v16  ;;  %v1530_v41 = vld [vmem:[%s3117_s15 + $0xd0] sm:$0xff]  ;;  %v1561_v30 = vld [vmem:[%s3117_s15 + $0x1c8] sm:$0xff]  ;;  %v1544_v9 = vld [vmem:[%s3117_s15 + $0x140] sm:$0xff] }
 0x133   : > { %1583 = vmatpush.msra.mxu0 %v1516_v17  ;;  %1624 = vmatpush.msra.mxu2 %v1547_v20  ;;  %v1513_v3 = vld [vmem:[%s3117_s15 + $0x48] sm:$0xff]  ;;  %v1560_v58 = vld [vmem:[%s3117_s15 + $0x1c0] sm:$0xff]  ;;  %v1543_v37 = vld [vmem:[%s3117_s15 + $0x138] sm:$0xff] }
 0x134   : > { %1603 = vmatpush.msra.mxu1 %v1532_v53  ;;  %1644 = vmatpush.msra.mxu3 %v1563_v31  ;;  %v1529_v0 = vld [vmem:[%s3117_s15 + $0xc8] sm:$0xff]  ;;  %v1512_v19 = vld [vmem:[%s3117_s15 + $0x40] sm:$0xff]  ;;  %v1559_v52 = vld [vmem:[%s3117_s15 + $0x1b8] sm:$0xff] }
 0x135   : > { %1584 = vmatpush.msra.mxu0 %v1515_v23  ;;  %1625 = vmatpush.msra.mxu2 %v1546_v43  ;;  %v1528_v22 = vld [vmem:[%s3117_s15 + $0xc0] sm:$0xff]  ;;  %v1511_v42 = vld [vmem:[%s3117_s15 + $0x38] sm:$0xff]  ;;  %v1542_v60 = vld [vmem:[%s3117_s15 + $0x130] sm:$0xff] }
 0x136   : > { %1604 = vmatpush.msra.mxu1 %v1531_v40  ;;  %1645 = vmatpush.msra.mxu3 %v1562_v26  ;;  %v1527_v51 = vld [vmem:[%s3117_s15 + $0xb8] sm:$0xff]  ;;  %v1558_v33 = vld [vmem:[%s3117_s15 + $0x1b0] sm:$0xff]  ;;  %v1541_v47 = vld [vmem:[%s3117_s15 + $0x128] sm:$0xff] }
 0x137   : > { %1585 = vmatpush.msra.mxu0 %v1514_v7  ;;  %1626 = vmatpush.msra.mxu2 %v1545_v27  ;;  %v1510_v8 = vld [vmem:[%s3117_s15 + $0x30] sm:$0xff]  ;;  %v1557_v62 = vld [vmem:[%s3117_s15 + $0x1a8] sm:$0xff]  ;;  %v1540_v6 = vld [vmem:[%s3117_s15 + $0x120] sm:$0xff] }
 0x138   : > { %1605 = vmatpush.msra.mxu1 %v1530_v41  ;;  %1646 = vmatpush.msra.mxu3 %v1561_v30  ;;  %v1526_v48 = vld [vmem:[%s3117_s15 + $0xb0] sm:$0xff]  ;;  %v1509_v35 = vld [vmem:[%s3117_s15 + $0x28] sm:$0xff]  ;;  %v1556_v21 = vld [vmem:[%s3117_s15 + $0x1a0] sm:$0xff] }
 0x139   : > { %1586 = vmatpush.msra.mxu0 %v1513_v3  ;;  %1627 = vmatpush.msra.mxu2 %v1544_v9  ;;  %v1525_v57 = vld [vmem:[%s3117_s15 + $0xa8] sm:$0xff]  ;;  %v1508_v56 = vld [vmem:[%s3117_s15 + $0x20] sm:$0xff]  ;;  %v1539_v59 = vld [vmem:[%s3117_s15 + $0x118] sm:$0xff] }
 0x13a   : > { %1606 = vmatpush.msra.mxu1 %v1529_v0  ;;  %1647 = vmatpush.msra.mxu3 %v1560_v58  ;;  %v1524_v28 = vld [vmem:[%s3117_s15 + $0xa0] sm:$0xff]  ;;  %v1555_v16 = vld [vmem:[%s3117_s15 + $0x198] sm:$0xff]  ;;  %v1538_v20 = vld [vmem:[%s3117_s15 + $0x110] sm:$0xff] }
 0x13b   : > { %1587 = vmatpush.msra.mxu0 %v1512_v19  ;;  %1628 = vmatpush.msra.mxu2 %v1543_v37  ;;  %v1507_v17 = vld [vmem:[%s3117_s15 + $0x18] sm:$0xff]  ;;  %v1554_v31 = vld [vmem:[%s3117_s15 + $0x190] sm:$0xff]  ;;  %v1537_v43 = vld [vmem:[%s3117_s15 + $0x108] sm:$0xff] }
 0x13c   : > { %1607 = vmatpush.msra.mxu1 %v1528_v22  ;;  %1648 = vmatpush.msra.mxu3 %v1559_v52  ;;  %v1523_v53 = vld [vmem:[%s3117_s15 + $0x98] sm:$0xff]  ;;  %v1506_v23 = vld [vmem:[%s3117_s15 + $0x10] sm:$0xff]  ;;  %v1553_v26 = vld [vmem:[%s3117_s15 + $0x188] sm:$0xff] }
 0x13d   : > { %1588 = vmatpush.msra.mxu0 %v1511_v42  ;;  %1629 = vmatpush.msra.mxu2 %v1542_v60  ;;  %v1522_v40 = vld [vmem:[%s3117_s15 + $0x90] sm:$0xff]  ;;  %v1505_v7 = vld [vmem:[%s3117_s15 + $0x8] sm:$0xff]  ;;  %v1536_v27 = vld [vmem:[%s3117_s15 + $0x100] sm:$0xff] }
 0x13e   : > { %1608 = vmatpush.msra.mxu1 %v1527_v51  ;;  %1649 = vmatpush.msra.mxu3 %v1558_v33  ;;  %v1521_v41 = vld [vmem:[%s3117_s15 + $0x88] sm:$0xff]  ;;  %v1552_v30 = vld [vmem:[%s3117_s15 + $0x180] sm:$0xff]  ;;  %v2474_v3 = vld [vmem:[%s3117_s15 + $0x378] sm:$0xff] }
 0x13f   : > { %1589 = vmatpush.msra.mxu0 %v1510_v8  ;;  %1630 = vmatpush.msra.mxu2 %v1541_v47  ;;  %v2490_v0 = vld [vmem:[%s3117_s15 + $0x3f8] sm:$0xff]  ;;  %v1504_v9 = vld [vmem:[%s3117_s15] sm:$0xff]  ;;  %v2473_v19 = vld [vmem:[%s3117_s15 + $0x370] sm:$0xff] }
 0x140   : > { %1609 = vmatpush.msra.mxu1 %v1526_v48  ;;  %1650 = vmatpush.msra.mxu3 %v1557_v62  ;;  %v1520_v58 = vld [vmem:[%s3117_s15 + $0x80] sm:$0xff]  ;;  %v2442_v22 = vld [vmem:[%s3117_s15 + $0x278] sm:$0xff]  ;;  %v2489_v52 = vld [vmem:[%s3117_s15 + $0x3f0] sm:$0xff] }
 0x141   : > { %1590 = vmatpush.msra.mxu0 %v1509_v35  ;;  %1631 = vmatpush.msra.mxu2 %v1540_v6  ;;  %v2458_v37 = vld [vmem:[%s3117_s15 + $0x2f8] sm:$0xff]  ;;  %v2472_v42 = vld [vmem:[%s3117_s15 + $0x368] sm:$0xff]  ;;  %v2441_v51 = vld [vmem:[%s3117_s15 + $0x270] sm:$0xff] }
 0x142   : > { %1610 = vmatpush.msra.mxu1 %v1525_v57  ;;  %1651 = vmatpush.msra.mxu3 %v1556_v21  ;;  %v2457_v60 = vld [vmem:[%s3117_s15 + $0x2f0] sm:$0xff]  ;;  %v2488_v33 = vld [vmem:[%s3117_s15 + $0x3e8] sm:$0xff]  ;;  %v2471_v8 = vld [vmem:[%s3117_s15 + $0x360] sm:$0xff] }
 0x143   : > { %1591 = vmatpush.msra.mxu0 %v1508_v56  ;;  %1632 = vmatpush.msra.mxu2 %v1539_v59  ;;  %v2440_v48 = vld [vmem:[%s3117_s15 + $0x268] sm:$0xff]  ;;  %v2487_v62 = vld [vmem:[%s3117_s15 + $0x3e0] sm:$0xff]  ;;  %v2470_v35 = vld [vmem:[%s3117_s15 + $0x358] sm:$0xff] }
 0x144   : > { %1611 = vmatpush.msra.mxu1 %v1524_v28  ;;  %1652 = vmatpush.msra.mxu3 %v1555_v16  ;;  %v2456_v47 = vld [vmem:[%s3117_s15 + $0x2e8] sm:$0xff]  ;;  %v2439_v57 = vld [vmem:[%s3117_s15 + $0x260] sm:$0xff]  ;;  %v2486_v21 = vld [vmem:[%s3117_s15 + $0x3d8] sm:$0xff] }
 0x145   : > { %1592 = vmatpush.msra.mxu0 %v1507_v17  ;;  %1633 = vmatpush.msra.mxu2 %v1538_v20  ;;  %v2455_v6 = vld [vmem:[%s3117_s15 + $0x2e0] sm:$0xff]  ;;  %v2469_v56 = vld [vmem:[%s3117_s15 + $0x350] sm:$0xff]  ;;  %v2438_v28 = vld [vmem:[%s3117_s15 + $0x258] sm:$0xff] }
 0x146   : > { %1612 = vmatpush.msra.mxu1 %v1523_v53  ;;  %1653 = vmatpush.msra.mxu3 %v1554_v31  ;;  %v2454_v59 = vld [vmem:[%s3117_s15 + $0x2d8] sm:$0xff]  ;;  %v2485_v16 = vld [vmem:[%s3117_s15 + $0x3d0] sm:$0xff]  ;;  %v2468_v17 = vld [vmem:[%s3117_s15 + $0x348] sm:$0xff] }
 0x147   : > { %1593 = vmatpush.msra.mxu0 %v1506_v23  ;;  %1634 = vmatpush.msra.mxu2 %v1537_v43  ;;  %v2437_v53 = vld [vmem:[%s3117_s15 + $0x250] sm:$0xff]  ;;  %v2484_v31 = vld [vmem:[%s3117_s15 + $0x3c8] sm:$0xff]  ;;  %v2467_v23 = vld [vmem:[%s3117_s15 + $0x340] sm:$0xff] }
 0x148   : > { %1613 = vmatpush.msra.mxu1 %v1522_v40  ;;  %1654 = vmatpush.msra.mxu3 %v1553_v26  ;;  %v2453_v20 = vld [vmem:[%s3117_s15 + $0x2d0] sm:$0xff]  ;;  %v2436_v40 = vld [vmem:[%s3117_s15 + $0x248] sm:$0xff]  ;;  %v2483_v26 = vld [vmem:[%s3117_s15 + $0x3c0] sm:$0xff] }
 0x149   : > { %1594 = vmatpush.msra.mxu0 %v1505_v7  ;;  %1635 = vmatpush.msra.mxu2 %v1536_v27  ;;  %v2452_v43 = vld [vmem:[%s3117_s15 + $0x2c8] sm:$0xff]  ;;  %v2466_v7 = vld [vmem:[%s3117_s15 + $0x338] sm:$0xff]  ;;  %v2451_v27 = vld [vmem:[%s3117_s15 + $0x2c0] sm:$0xff] }
 0x14a   : > { %1614 = vmatpush.msra.mxu1 %v1521_v41  ;;  %1655 = vmatpush.msra.mxu3 %v1552_v30  ;;  %v2435_v41 = vld [vmem:[%s3117_s15 + $0x240] sm:$0xff]  ;;  %v2482_v30 = vld [vmem:[%s3117_s15 + $0x3b8] sm:$0xff] }
 0x14b   : > { %1777 = vmatpush.msrb.mxu2 %v2474_v3  ;;  %1595 = vmatpush.msra.mxu0 %v1504_v9  ;;  %v2465_v3 = vld [vmem:[%s3117_s15 + $0x330] sm:$0xff]  ;;  %v2450_v9 = vld [vmem:[%s3117_s15 + $0x2b8] sm:$0xff] }
 0x14c   : > { %1797 = vmatpush.msrb.mxu3 %v2490_v0  ;;  %1615 = vmatpush.msra.mxu1 %v1520_v58  ;;  %v2434_v0 = vld [vmem:[%s3117_s15 + $0x238] sm:$0xff]  ;;  %v2481_v58 = vld [vmem:[%s3117_s15 + $0x3b0] sm:$0xff] }
 0x14d   : > { %1778 = vmatpush.msrb.mxu2 %v2473_v19  ;;  %1737 = vmatpush.msrb.mxu0 %v2442_v22  ;;  %v1572_v19 = vrot.slane %v3629_v29, 7  ;;  %v2464_v22 = vld [vmem:[%s3117_s15 + $0x328] sm:$0xff] }
 0x14e   : > { %1757 = vmatpush.msrb.mxu1 %v2458_v37  ;;  %1798 = vmatpush.msrb.mxu3 %v2489_v52  ;;  %v2433_v37 = vld [vmem:[%s3117_s15 + $0x230] sm:$0xff] }
 0x14f   : > { %1779 = vmatpush.msrb.mxu2 %v2472_v42  ;;  %1738 = vmatpush.msrb.mxu0 %v2441_v51  ;;  %v2449_v52 = vld [vmem:[%s3117_s15 + $0x2b0] sm:$0xff]  ;;  %v2480_v42 = vld [vmem:[%s3117_s15 + $0x3a8] sm:$0xff]  ;;  %v1574_v51 = vrot.slane %v3631_v36, 7  ;;  %v1573_v29 = vsel %vm1335_vm3, %v1572_v19, %v3595_v4  ;;  %v2479_v36 = vld [vmem:[%s3117_s15 + $0x3a0] sm:$0xff] }
 0x150   : > { %1758 = vmatpush.msrb.mxu1 %v2457_v60  ;;  %1799 = vmatpush.msrb.mxu3 %v2488_v33  ;;  %v2463_v60 = vld [vmem:[%s3117_s15 + $0x320] sm:$0xff]  ;;  %v2432_v33 = vld [vmem:[%s3117_s15 + $0x228] sm:$0xff] }
 0x151   : > { %1780 = vmatpush.msrb.mxu2 %v2471_v8  ;;  %1739 = vmatpush.msrb.mxu0 %v2440_v48  ;;  %v2448_v8 = vld [vmem:[%s3117_s15 + $0x2a8] sm:$0xff]  ;;  %v4332_v48 = vld [vmem:[#allocation50_spill] sm:$0xff] }
 0x152   : > { %1759 = vmatpush.msrb.mxu1 %v2456_v47  ;;  %1800 = vmatpush.msrb.mxu3 %v2487_v62  ;;  %v1568_v47 = vrot.slane %v4332_v48, 7  ;;  %v2462_v62 = vld [vmem:[%s3117_s15 + $0x318] sm:$0xff]  ;;  %v2447_v4 = vld [vmem:[%s3117_s15 + $0x2a0] sm:$0xff] }
 0x153   : > { %1781 = vmatpush.msrb.mxu2 %v2470_v35  ;;  %1740 = vmatpush.msrb.mxu0 %v2439_v57  ;;  %v1570_v35 = vrot.slane %v3627_v49, 7  ;;  %v1575_v57 = vsel %vm1335_vm3, %v1574_v51, %v3597_v44 }
 0x154   : > { %1760 = vmatpush.msrb.mxu1 %v2455_v6  ;;  %1801 = vmatpush.msrb.mxu3 %v2486_v21  ;;  %v2431_v6 = vld [vmem:[%s3117_s15 + $0x220] sm:$0xff]  ;;  %v2461_v21 = vld [vmem:[%s3117_s15 + $0x310] sm:$0xff]  ;;  %v1569_v49 = vsel %vm1335_vm3, %v1568_v47, %v3591_v15 }
 0x155   : > { %1782 = vmatpush.msrb.mxu2 %v2469_v56  ;;  %1741 = vmatpush.msrb.mxu0 %v2438_v28  ;;  %v2478_v56 = vld [vmem:[%s3117_s15 + $0x398] sm:$0xff]  ;;  %v1571_v44 = vsel %vm1335_vm3, %v1570_v35, %v3593_v39  ;;  %v2477_v15 = vld [vmem:[%s3117_s15 + $0x390] sm:$0xff]  ;;  %v1731_v39 = vrot.slane %v3647_v24, 7 }
 0x156   : > { %1761 = vmatpush.msrb.mxu1 %v2454_v59  ;;  %1802 = vmatpush.msrb.mxu3 %v2485_v16  ;;  %v2430_v28 = vld [vmem:[%s3117_s15 + $0x218] sm:$0xff]  ;;  %v1729_v59 = vrot.slane %v3645_v38, 7  ;;  %v2476_v38 = vld [vmem:[%s3117_s15 + $0x388] sm:$0xff] }
 0x157   : > { %1783 = vmatpush.msrb.mxu2 %v2468_v17  ;;  %1742 = vmatpush.msrb.mxu0 %v2437_v53  ;;  %v2446_v16 = vld [vmem:[%s3117_s15 + $0x298] sm:$0xff]  ;;  %v2460_v17 = vld [vmem:[%s3117_s15 + $0x308] sm:$0xff]  ;;  %v2429_v53 = vld [vmem:[%s3117_s15 + $0x210] sm:$0xff]  ;;  %v1732_v24 = vsel %vm1335_vm3, %v1731_v39, %v3613_v10 }
 0x158   : > { %1762 = vmatpush.msrb.mxu1 %v2453_v20  ;;  %1803 = vmatpush.msrb.mxu3 %v2484_v31  ;;  %v2445_v20 = vld [vmem:[%s3117_s15 + $0x290] sm:$0xff]  ;;  %v2459_v31 = vld [vmem:[%s3117_s15 + $0x300] sm:$0xff] }
 0x159   : > { %1784 = vmatpush.msrb.mxu2 %v2467_v23  ;;  %1743 = vmatpush.msrb.mxu0 %v2436_v40  ;;  %v1730_v23 = vsel %vm1335_vm3, %v1729_v59, %v3611_v54  ;;  %v4333_v40 = vld [vmem:[#allocation52_spill] sm:$0xff]  ;;  %v2443_v54 = vld [vmem:[%s3117_s15 + $0x280] sm:$0xff] }
 0x15a   : > { %1763 = vmatpush.msrb.mxu1 %v2452_v43  ;;  %1804 = vmatpush.msrb.mxu3 %v2483_v26  ;;  %v1725_v43 = vrot.slane %v4333_v40, 7  ;;  %v2428_v26 = vld [vmem:[%s3117_s15 + $0x208] sm:$0xff] }
 0x15b   : > { %1785 = vmatpush.msrb.mxu2 %v2466_v7  ;;  %1744 = vmatpush.msrb.mxu0 %v2435_v41  ;;  %v2444_v7 = vld [vmem:[%s3117_s15 + $0x288] sm:$0xff]  ;;  %v1727_v41 = vrot.slane %v3643_v13, 7 }
 0x15c   : > { %1764 = vmatpush.msrb.mxu1 %v2451_v27  ;;  %1805 = vmatpush.msrb.mxu3 %v2482_v30  ;;  %v2475_v27 = vld [vmem:[%s3117_s15 + $0x380] sm:$0xff] }
 0x15d   : > { %1786 = vmatpush.msrb.mxu2 %v2465_v3  ;;  %1745 = vmatpush.msrb.mxu0 %v2434_v0  ;;  %v2427_v30 = vld [vmem:[%s3117_s15 + $0x200] sm:$0xff]  ;;  %v1726_v3 = vsel %vm1335_vm3, %v1725_v43, %v3607_v61  ;;  %v1728_v0 = vsel %vm1335_vm3, %v1727_v41, %v3609_v50 }
 0x15e   : > { %1765 = vmatpush.msrb.mxu1 %v2450_v9  ;;  %1806 = vmatpush.msrb.mxu3 %v2481_v58 }
 0x15f   : > { %1787 = vmatpush.msrb.mxu2 %v2464_v22  ;;  %1746 = vmatpush.msrb.mxu0 %v2433_v37 }
 0x160   : > { %1766 = vmatpush.msrb.mxu1 %v2449_v52  ;;  %1807 = vmatpush.msrb.mxu3 %v2480_v42 }
 0x161   : > { %1788 = vmatpush.msrb.mxu2 %v2463_v60  ;;  %1747 = vmatpush.msrb.mxu0 %v2432_v33 }
 0x162   : > { %1636 = vmatmul.f32.vlgmr.msra.gmra.mxu2 %v1573_v29  ;;  %1767 = vmatpush.msrb.mxu1 %v2448_v8 }
 0x163   : > { %1789 = vmatpush.msrb.mxu2 %v2462_v62  ;;  %1808 = vmatpush.msrb.mxu3 %v2479_v36 }
 0x164   : > { %1656 = vmatmul.f32.vlgmr.msra.gmra.mxu3 %v1575_v57  ;;  %1748 = vmatpush.msrb.mxu0 %v2431_v6 }
 0x165   : > { %1768 = vmatpush.msrb.mxu1 %v2447_v4  ;;  %1790 = vmatpush.msrb.mxu2 %v2461_v21 }
 0x166   : > { %1809 = vmatpush.msrb.mxu3 %v2478_v56  ;;  %1596 = vmatmul.f32.vlgmr.msra.gmra.mxu0 %v1569_v49 }
 0x167   : > { %1616 = vmatmul.f32.vlgmr.msra.gmra.mxu1 %v1571_v44  ;;  %1749 = vmatpush.msrb.mxu0 %v2430_v28 }
 0x168   : > { %1769 = vmatpush.msrb.mxu1 %v2446_v16  ;;  %1791 = vmatpush.msrb.mxu2 %v2460_v17 }
 0x169   : > { %1810 = vmatpush.msrb.mxu3 %v2477_v15  ;;  %1750 = vmatpush.msrb.mxu0 %v2429_v53 }
 0x16a   : > { %1770 = vmatpush.msrb.mxu1 %v2445_v20  ;;  %1792 = vmatpush.msrb.mxu2 %v2459_v31 }
 0x16b   : > { %1811 = vmatpush.msrb.mxu3 %v2476_v38  ;;  %1793 = vmatmul.f32.vlgmr.msrb.gmra.mxu2 %v1730_v23 }
 0x16c   : > { %1751 = vmatpush.msrb.mxu0 %v2428_v26  ;;  %1771 = vmatpush.msrb.mxu1 %v2444_v7 }
 0x16d   : > { %1812 = vmatpush.msrb.mxu3 %v2475_v27 }
 0x16e   : > { %1813 = vmatmul.f32.vlgmr.msrb.gmra.mxu3 %v1732_v24  ;;  %1752 = vmatpush.msrb.mxu0 %v2427_v30 }
 0x16f   : > { %1772 = vmatpush.msrb.mxu1 %v2443_v54  ;;  %1753 = vmatmul.f32.vlgmr.msrb.gmra.mxu0 %v1726_v3 }
 0x170   : > { %1773 = vmatmul.f32.vlgmr.msrb.gmra.mxu1 %v1728_v0 }
 0x1e3   : > { %v1597_v13 = vpop.f32.mrf.mxu0 }
 0x1e4   : > { %v1617_v9 = vpop.f32.mrf.mxu1 }
 0x1e5   : > { %v1637_v10 = vpop.f32.mrf.mxu2  ;;  %v1618_v19 = vadd.f32 %v1617_v9, %v1597_v13 }
 0x1e7   : > { %v1657_v58 = vpop.f32.mrf.mxu3  ;;  %v1638_v61 = vadd.f32 %v1637_v10, %v1618_v19 }
 0x1e9   : > { %v1658_v50 = vadd.f32 %v1657_v58, %v1638_v61 }
 0x1ec   : > { %v1754_v22 = vpop.f32.mrf.mxu0 }
 0x1ed   : > { %v1774_v37 = vpop.f32.mrf.mxu1 }
 0x1ee   : > { %v1775_v52 = vadd.f32 %v1774_v37, %v1754_v22  ;;  %v1794_v42 = vpop.f32.mrf.mxu2 }
 0x1f0   : > { %v1795_v51 = vadd.f32 %v1794_v42, %v1775_v52 }
 0x1f1   : > { %v1814_v60 = vpop.f32.mrf.mxu3 }
 0x1f2   : > { %v1815_v33 = vadd.f32 %v1814_v60, %v1795_v51 }
 0x1f4   : > { %v1819_v29 = vrot.slane %v1815_v33, 6 }
 0x1f6   : > { %v1820_v8 = vsel %vm1303_vm0, %v1658_v50, %v1819_v29 }
 0x1f7   : > { %1822 = vst [vmem:[%s3823_s20] sm:$0xf] %v1820_v8 }
 0x1f8 PF: > { %p2491_p2 = scmp.ne.s32.totalorder %s4346_s9, 1 }
 0x1fa   : > { %1826 = sbr.rel (%p2491_p2) target bundleno = 717 (0x2cd), region = 60 }
 0x1ff   : > { %v1874_v48 = vld [vmem:[%s3117_s15 + $0x178] sm:$0xff]  ;;  %v1873_v47 = vld [vmem:[%s3117_s15 + $0x170] sm:$0xff]  ;;  %v1872_v57 = vld [vmem:[%s3117_s15 + $0x168] sm:$0xff] }
 0x200   : > { %v1890_v62 = vld [vmem:[%s3117_s15 + $0x1f8] sm:$0xff]  ;;  %1943 = vmatpush.msra.mxu2 %v1874_v48  ;;  %v1889_v6 = vld [vmem:[%s3117_s15 + $0x1f0] sm:$0xff]  ;;  %v1888_v56 = vld [vmem:[%s3117_s15 + $0x1e8] sm:$0xff] }
 0x201   : > { %1963 = vmatpush.msra.mxu3 %v1890_v62  ;;  %v1842_v36 = vld [vmem:[%s3117_s15 + $0x78] sm:$0xff]  ;;  %v1841_v4 = vld [vmem:[%s3117_s15 + $0x70] sm:$0xff]  ;;  %v1840_v49 = vld [vmem:[%s3117_s15 + $0x68] sm:$0xff] }
 0x202   : > { %v1858_v35 = vld [vmem:[%s3117_s15 + $0xf8] sm:$0xff]  ;;  %1903 = vmatpush.msra.mxu0 %v1842_v36  ;;  %v1857_v21 = vld [vmem:[%s3117_s15 + $0xf0] sm:$0xff]  ;;  %1944 = vmatpush.msra.mxu2 %v1873_v47  ;;  %v1871_v44 = vld [vmem:[%s3117_s15 + $0x160] sm:$0xff] }
 0x203   : > { %1923 = vmatpush.msra.mxu1 %v1858_v35  ;;  %1964 = vmatpush.msra.mxu3 %v1889_v6  ;;  %v1856_v28 = vld [vmem:[%s3117_s15 + $0xe8] sm:$0xff]  ;;  %v1887_v59 = vld [vmem:[%s3117_s15 + $0x1e0] sm:$0xff]  ;;  %v1870_v15 = vld [vmem:[%s3117_s15 + $0x158] sm:$0xff] }
 0x204   : > { %1904 = vmatpush.msra.mxu0 %v1841_v4  ;;  %1945 = vmatpush.msra.mxu2 %v1872_v57  ;;  %v1839_v16 = vld [vmem:[%s3117_s15 + $0x60] sm:$0xff]  ;;  %v1886_v53 = vld [vmem:[%s3117_s15 + $0x1d8] sm:$0xff]  ;;  %v1869_v39 = vld [vmem:[%s3117_s15 + $0x150] sm:$0xff] }
 0x205   : > { %1924 = vmatpush.msra.mxu1 %v1857_v21  ;;  %1965 = vmatpush.msra.mxu3 %v1888_v56  ;;  %v1855_v17 = vld [vmem:[%s3117_s15 + $0xe0] sm:$0xff]  ;;  %v1838_v20 = vld [vmem:[%s3117_s15 + $0x58] sm:$0xff]  ;;  %v1885_v38 = vld [vmem:[%s3117_s15 + $0x1d0] sm:$0xff] }
 0x206   : > { %1905 = vmatpush.msra.mxu0 %v1840_v49  ;;  %1946 = vmatpush.msra.mxu2 %v1871_v44  ;;  %v1854_v31 = vld [vmem:[%s3117_s15 + $0xd8] sm:$0xff]  ;;  %v1837_v23 = vld [vmem:[%s3117_s15 + $0x50] sm:$0xff]  ;;  %v1868_v43 = vld [vmem:[%s3117_s15 + $0x148] sm:$0xff] }
 0x207   : > { %1925 = vmatpush.msra.mxu1 %v1856_v28  ;;  %1966 = vmatpush.msra.mxu3 %v1887_v59  ;;  %v1853_v40 = vld [vmem:[%s3117_s15 + $0xd0] sm:$0xff]  ;;  %v1884_v26 = vld [vmem:[%s3117_s15 + $0x1c8] sm:$0xff]  ;;  %v1867_v27 = vld [vmem:[%s3117_s15 + $0x140] sm:$0xff] }
 0x208   : > { %1906 = vmatpush.msra.mxu0 %v1839_v16  ;;  %1947 = vmatpush.msra.mxu2 %v1870_v15  ;;  %v1836_v7 = vld [vmem:[%s3117_s15 + $0x48] sm:$0xff]  ;;  %v1883_v24 = vld [vmem:[%s3117_s15 + $0x1c0] sm:$0xff]  ;;  %v1866_v3 = vld [vmem:[%s3117_s15 + $0x138] sm:$0xff] }
 0x209   : > { %1926 = vmatpush.msra.mxu1 %v1855_v17  ;;  %1967 = vmatpush.msra.mxu3 %v1886_v53  ;;  %v1852_v41 = vld [vmem:[%s3117_s15 + $0xc8] sm:$0xff]  ;;  %v1835_v30 = vld [vmem:[%s3117_s15 + $0x40] sm:$0xff]  ;;  %v1882_v0 = vld [vmem:[%s3117_s15 + $0x1b8] sm:$0xff] }
 0x20a   : > { %1907 = vmatpush.msra.mxu0 %v1838_v20  ;;  %1948 = vmatpush.msra.mxu2 %v1869_v39  ;;  %v1851_v54 = vld [vmem:[%s3117_s15 + $0xc0] sm:$0xff]  ;;  %v1834_v13 = vld [vmem:[%s3117_s15 + $0x38] sm:$0xff]  ;;  %v1865_v10 = vld [vmem:[%s3117_s15 + $0x130] sm:$0xff] }
 0x20b   : > { %1927 = vmatpush.msra.mxu1 %v1854_v31  ;;  %1968 = vmatpush.msra.mxu3 %v1885_v38  ;;  %v1850_v9 = vld [vmem:[%s3117_s15 + $0xb8] sm:$0xff]  ;;  %v1881_v58 = vld [vmem:[%s3117_s15 + $0x1b0] sm:$0xff]  ;;  %v1864_v37 = vld [vmem:[%s3117_s15 + $0x128] sm:$0xff] }
 0x20c   : > { %1908 = vmatpush.msra.mxu0 %v1837_v23  ;;  %1949 = vmatpush.msra.mxu2 %v1868_v43  ;;  %v1833_v19 = vld [vmem:[%s3117_s15 + $0x30] sm:$0xff]  ;;  %v1880_v52 = vld [vmem:[%s3117_s15 + $0x1a8] sm:$0xff]  ;;  %v1863_v51 = vld [vmem:[%s3117_s15 + $0x120] sm:$0xff] }
 0x20d   : > { %1928 = vmatpush.msra.mxu1 %v1853_v40  ;;  %1969 = vmatpush.msra.mxu3 %v1884_v26  ;;  %v1849_v22 = vld [vmem:[%s3117_s15 + $0xb0] sm:$0xff]  ;;  %v1832_v42 = vld [vmem:[%s3117_s15 + $0x28] sm:$0xff]  ;;  %v1879_v60 = vld [vmem:[%s3117_s15 + $0x1a0] sm:$0xff] }
 0x20e   : > { %1909 = vmatpush.msra.mxu0 %v1836_v7  ;;  %1950 = vmatpush.msra.mxu2 %v1867_v27  ;;  %v1848_v61 = vld [vmem:[%s3117_s15 + $0xa8] sm:$0xff]  ;;  %v1831_v33 = vld [vmem:[%s3117_s15 + $0x20] sm:$0xff]  ;;  %v1862_v29 = vld [vmem:[%s3117_s15 + $0x118] sm:$0xff] }
 0x20f   : > { %1929 = vmatpush.msra.mxu1 %v1852_v41  ;;  %1970 = vmatpush.msra.mxu3 %v1883_v24  ;;  %v1847_v50 = vld [vmem:[%s3117_s15 + $0xa0] sm:$0xff]  ;;  %v1878_v8 = vld [vmem:[%s3117_s15 + $0x198] sm:$0xff]  ;;  %v1861_v62 = vld [vmem:[%s3117_s15 + $0x110] sm:$0xff] }
 0x210   : > { %1910 = vmatpush.msra.mxu0 %v1835_v30  ;;  %1951 = vmatpush.msra.mxu2 %v1866_v3  ;;  %v1830_v48 = vld [vmem:[%s3117_s15 + $0x18] sm:$0xff]  ;;  %v1877_v36 = vld [vmem:[%s3117_s15 + $0x190] sm:$0xff]  ;;  %v1860_v6 = vld [vmem:[%s3117_s15 + $0x108] sm:$0xff] }
 0x211   : > { %1930 = vmatpush.msra.mxu1 %v1851_v54  ;;  %1971 = vmatpush.msra.mxu3 %v1882_v0  ;;  %v1846_v47 = vld [vmem:[%s3117_s15 + $0x98] sm:$0xff]  ;;  %v1829_v35 = vld [vmem:[%s3117_s15 + $0x10] sm:$0xff]  ;;  %v1876_v4 = vld [vmem:[%s3117_s15 + $0x188] sm:$0xff] }
 0x212   : > { %1911 = vmatpush.msra.mxu0 %v1834_v13  ;;  %1952 = vmatpush.msra.mxu2 %v1865_v10  ;;  %v1845_v57 = vld [vmem:[%s3117_s15 + $0x90] sm:$0xff]  ;;  %v1828_v21 = vld [vmem:[%s3117_s15 + $0x8] sm:$0xff]  ;;  %v1859_v49 = vld [vmem:[%s3117_s15 + $0x100] sm:$0xff] }
 0x213   : > { %1931 = vmatpush.msra.mxu1 %v1850_v9  ;;  %1972 = vmatpush.msra.mxu3 %v1881_v58  ;;  %v1844_v56 = vld [vmem:[%s3117_s15 + $0x88] sm:$0xff]  ;;  %v1875_v44 = vld [vmem:[%s3117_s15 + $0x180] sm:$0xff]  ;;  %v2539_v28 = vld [vmem:[%s3117_s15 + $0x378] sm:$0xff] }
 0x214   : > { %1912 = vmatpush.msra.mxu0 %v1833_v19  ;;  %1953 = vmatpush.msra.mxu2 %v1864_v37  ;;  %v2555_v59 = vld [vmem:[%s3117_s15 + $0x3f8] sm:$0xff]  ;;  %v1827_v16 = vld [vmem:[%s3117_s15] sm:$0xff]  ;;  %v2538_v15 = vld [vmem:[%s3117_s15 + $0x370] sm:$0xff] }
 0x215   : > { %1932 = vmatpush.msra.mxu1 %v1849_v22  ;;  %1973 = vmatpush.msra.mxu3 %v1880_v52  ;;  %v1843_v17 = vld [vmem:[%s3117_s15 + $0x80] sm:$0xff]  ;;  %v2507_v53 = vld [vmem:[%s3117_s15 + $0x278] sm:$0xff]  ;;  %v2554_v31 = vld [vmem:[%s3117_s15 + $0x3f0] sm:$0xff] }
 0x216   : > { %1913 = vmatpush.msra.mxu0 %v1832_v42  ;;  %1954 = vmatpush.msra.mxu2 %v1863_v51  ;;  %v2523_v20 = vld [vmem:[%s3117_s15 + $0x2f8] sm:$0xff]  ;;  %v2537_v39 = vld [vmem:[%s3117_s15 + $0x368] sm:$0xff]  ;;  %v2506_v38 = vld [vmem:[%s3117_s15 + $0x270] sm:$0xff] }
 0x217   : > { %1933 = vmatpush.msra.mxu1 %v1848_v61  ;;  %1974 = vmatpush.msra.mxu3 %v1879_v60  ;;  %v2522_v23 = vld [vmem:[%s3117_s15 + $0x2f0] sm:$0xff]  ;;  %v2553_v40 = vld [vmem:[%s3117_s15 + $0x3e8] sm:$0xff]  ;;  %v2536_v43 = vld [vmem:[%s3117_s15 + $0x360] sm:$0xff] }
 0x218   : > { %1914 = vmatpush.msra.mxu0 %v1831_v33  ;;  %1955 = vmatpush.msra.mxu2 %v1862_v29  ;;  %v2505_v26 = vld [vmem:[%s3117_s15 + $0x268] sm:$0xff]  ;;  %v2552_v41 = vld [vmem:[%s3117_s15 + $0x3e0] sm:$0xff]  ;;  %v2535_v27 = vld [vmem:[%s3117_s15 + $0x358] sm:$0xff] }
 0x219   : > { %1934 = vmatpush.msra.mxu1 %v1847_v50  ;;  %1975 = vmatpush.msra.mxu3 %v1878_v8  ;;  %v2521_v7 = vld [vmem:[%s3117_s15 + $0x2e8] sm:$0xff]  ;;  %v2504_v24 = vld [vmem:[%s3117_s15 + $0x260] sm:$0xff]  ;;  %v2551_v54 = vld [vmem:[%s3117_s15 + $0x3d8] sm:$0xff] }
 0x21a   : > { %1915 = vmatpush.msra.mxu0 %v1830_v48  ;;  %1956 = vmatpush.msra.mxu2 %v1861_v62  ;;  %v2520_v30 = vld [vmem:[%s3117_s15 + $0x2e0] sm:$0xff]  ;;  %v2534_v3 = vld [vmem:[%s3117_s15 + $0x350] sm:$0xff]  ;;  %v2503_v0 = vld [vmem:[%s3117_s15 + $0x258] sm:$0xff]  ;;  %v1895_v62 = vrot.slane %v3637_v18, 7 }
 0x21b   : > { %1935 = vmatpush.msra.mxu1 %v1846_v47  ;;  %1976 = vmatpush.msra.mxu3 %v1877_v36  ;;  %v2519_v13 = vld [vmem:[%s3117_s15 + $0x2d8] sm:$0xff]  ;;  %v2550_v9 = vld [vmem:[%s3117_s15 + $0x3d0] sm:$0xff]  ;;  %v2533_v10 = vld [vmem:[%s3117_s15 + $0x348] sm:$0xff] }
 0x21c   : > { %1916 = vmatpush.msra.mxu0 %v1829_v35  ;;  %1957 = vmatpush.msra.mxu2 %v1860_v6  ;;  %v2502_v58 = vld [vmem:[%s3117_s15 + $0x250] sm:$0xff]  ;;  %v2549_v22 = vld [vmem:[%s3117_s15 + $0x3c8] sm:$0xff]  ;;  %v2532_v37 = vld [vmem:[%s3117_s15 + $0x340] sm:$0xff]  ;;  %v1896_v18 = vsel %vm1335_vm3, %v1895_v62, %v3603_v55 }
 0x21d   : > { %1936 = vmatpush.msra.mxu1 %v1845_v57  ;;  %1977 = vmatpush.msra.mxu3 %v1876_v4  ;;  %v2518_v19 = vld [vmem:[%s3117_s15 + $0x2d0] sm:$0xff]  ;;  %v2501_v52 = vld [vmem:[%s3117_s15 + $0x248] sm:$0xff]  ;;  %v2548_v61 = vld [vmem:[%s3117_s15 + $0x3c0] sm:$0xff]  ;;  %v1897_v4 = vrot.slane %v3639_v45, 7 }
 0x21e   : > { %1917 = vmatpush.msra.mxu0 %v1828_v21  ;;  %1958 = vmatpush.msra.mxu2 %v1859_v49  ;;  %v2517_v42 = vld [vmem:[%s3117_s15 + $0x2c8] sm:$0xff]  ;;  %v2531_v51 = vld [vmem:[%s3117_s15 + $0x338] sm:$0xff]  ;;  %v2500_v60 = vld [vmem:[%s3117_s15 + $0x240] sm:$0xff] }
 0x21f   : > { %1937 = vmatpush.msra.mxu1 %v1844_v56  ;;  %1978 = vmatpush.msra.mxu3 %v1875_v44  ;;  %v2516_v33 = vld [vmem:[%s3117_s15 + $0x2c0] sm:$0xff]  ;;  %v2547_v50 = vld [vmem:[%s3117_s15 + $0x3b8] sm:$0xff]  ;;  %v2530_v29 = vld [vmem:[%s3117_s15 + $0x330] sm:$0xff] }
 0x220   : > { %2100 = vmatpush.msrb.mxu2 %v2539_v28  ;;  %1918 = vmatpush.msra.mxu0 %v1827_v16  ;;  %v2499_v8 = vld [vmem:[%s3117_s15 + $0x238] sm:$0xff]  ;;  %v2546_v47 = vld [vmem:[%s3117_s15 + $0x3b0] sm:$0xff]  ;;  %v2529_v36 = vld [vmem:[%s3117_s15 + $0x328] sm:$0xff]  ;;  %v1893_v16 = vrot.slane %v3635_v63, 7 }
 0x221   : > { %2120 = vmatpush.msrb.mxu3 %v2555_v59  ;;  %1938 = vmatpush.msra.mxu1 %v1843_v17  ;;  %v2515_v48 = vld [vmem:[%s3117_s15 + $0x2b8] sm:$0xff]  ;;  %v2498_v35 = vld [vmem:[%s3117_s15 + $0x230] sm:$0xff]  ;;  %v2545_v6 = vld [vmem:[%s3117_s15 + $0x3a8] sm:$0xff]  ;;  %v1898_v17 = vsel %vm1335_vm3, %v1897_v4, %v3605_v12 }
 0x222   : > { %2101 = vmatpush.msrb.mxu2 %v2538_v15  ;;  %2060 = vmatpush.msrb.mxu0 %v2507_v53  ;;  %v2514_v57 = vld [vmem:[%s3117_s15 + $0x2b0] sm:$0xff]  ;;  %v2528_v21 = vld [vmem:[%s3117_s15 + $0x320] sm:$0xff]  ;;  %v2497_v56 = vld [vmem:[%s3117_s15 + $0x228] sm:$0xff]  ;;  %v1894_v12 = vsel %vm1335_vm3, %v1893_v16, %v3601_v11  ;;  %v2054_v11 = vrot.slane %v3716_v25, 7 }
 0x223   : > { %2080 = vmatpush.msrb.mxu1 %v2523_v20  ;;  %2121 = vmatpush.msrb.mxu3 %v2554_v31  ;;  %v2513_v49 = vld [vmem:[%s3117_s15 + $0x2a8] sm:$0xff]  ;;  %v2527_v59 = vld [vmem:[%s3117_s15 + $0x318] sm:$0xff]  ;;  %v2544_v45 = vld [vmem:[%s3117_s15 + $0x3a0] sm:$0xff] }
 0x224   : > { %2102 = vmatpush.msrb.mxu2 %v2537_v39  ;;  %2061 = vmatpush.msrb.mxu0 %v2506_v38  ;;  %v4334_v44 = vld [vmem:[#allocation51_spill] sm:$0xff]  ;;  %v2496_v15 = vld [vmem:[%s3117_s15 + $0x220] sm:$0xff]  ;;  %v2526_v53 = vld [vmem:[%s3117_s15 + $0x310] sm:$0xff]  ;;  %v2052_v39 = vrot.slane %v3653_v34, 7  ;;  %v2055_v25 = vsel %vm1335_vm3, %v2054_v11, %v3623_v5 }
 0x225   : > { %2081 = vmatpush.msrb.mxu1 %v2522_v23  ;;  %2122 = vmatpush.msrb.mxu3 %v2553_v40  ;;  %v1891_v28 = vrot.slane %v4334_v44, 7  ;;  %v2512_v55 = vld [vmem:[%s3117_s15 + $0x2a0] sm:$0xff]  ;;  %v2543_v20 = vld [vmem:[%s3117_s15 + $0x398] sm:$0xff]  ;;  %v2525_v23 = vld [vmem:[%s3117_s15 + $0x308] sm:$0xff] }
 0x226   : > { %2103 = vmatpush.msrb.mxu2 %v2536_v43  ;;  %2062 = vmatpush.msrb.mxu0 %v2505_v26  ;;  %v2495_v31 = vld [vmem:[%s3117_s15 + $0x218] sm:$0xff]  ;;  %v2494_v40 = vld [vmem:[%s3117_s15 + $0x210] sm:$0xff]  ;;  %v2524_v26 = vld [vmem:[%s3117_s15 + $0x300] sm:$0xff] }
 0x227   : > { %2082 = vmatpush.msrb.mxu1 %v2521_v7  ;;  %2123 = vmatpush.msrb.mxu3 %v2552_v41  ;;  %v1892_v63 = vsel %vm1335_vm3, %v1891_v28, %v3599_v46  ;;  %v2511_v38 = vld [vmem:[%s3117_s15 + $0x298] sm:$0xff]  ;;  %v2542_v46 = vld [vmem:[%s3117_s15 + $0x390] sm:$0xff]  ;;  %v2541_v34 = vld [vmem:[%s3117_s15 + $0x388] sm:$0xff]  ;;  %v2053_v7 = vsel %vm1335_vm3, %v2052_v39, %v3619_v32 }
 0x228   : > { %2104 = vmatpush.msrb.mxu2 %v2535_v27  ;;  %2063 = vmatpush.msrb.mxu0 %v2504_v24  ;;  %v2510_v43 = vld [vmem:[%s3117_s15 + $0x290] sm:$0xff]  ;;  %v4335_v41 = vld [vmem:[#allocation53_spill] sm:$0xff]  ;;  %v2493_v24 = vld [vmem:[%s3117_s15 + $0x208] sm:$0xff] }
 0x229   : > { %2083 = vmatpush.msrb.mxu1 %v2520_v30  ;;  %2124 = vmatpush.msrb.mxu3 %v2551_v54  ;;  %v2048_v27 = vrot.slane %v4335_v41, 7  ;;  %v2509_v30 = vld [vmem:[%s3117_s15 + $0x288] sm:$0xff]  ;;  %v2050_v54 = vrot.slane %v3651_v1, 7  ;;  %v2508_v32 = vld [vmem:[%s3117_s15 + $0x280] sm:$0xff] }
 0x22a   : > { %2105 = vmatpush.msrb.mxu2 %v2534_v3  ;;  %2064 = vmatpush.msrb.mxu0 %v2503_v0  ;;  %v2540_v3 = vld [vmem:[%s3117_s15 + $0x380] sm:$0xff] }
 0x22b   : > { %2084 = vmatpush.msrb.mxu1 %v2519_v13  ;;  %2125 = vmatpush.msrb.mxu3 %v2550_v9  ;;  %v2492_v0 = vld [vmem:[%s3117_s15 + $0x200] sm:$0xff]  ;;  %v2049_v13 = vsel %vm1335_vm3, %v2048_v27, %v3615_v2  ;;  %v2051_v9 = vsel %vm1335_vm3, %v2050_v54, %v3617_v14 }
 0x22c   : > { %2106 = vmatpush.msrb.mxu2 %v2533_v10  ;;  %2065 = vmatpush.msrb.mxu0 %v2502_v58 }
 0x22d   : > { %2085 = vmatpush.msrb.mxu1 %v2518_v19  ;;  %2126 = vmatpush.msrb.mxu3 %v2549_v22 }
 0x22e   : > { %2107 = vmatpush.msrb.mxu2 %v2532_v37  ;;  %2066 = vmatpush.msrb.mxu0 %v2501_v52 }
 0x22f   : > { %2086 = vmatpush.msrb.mxu1 %v2517_v42  ;;  %2127 = vmatpush.msrb.mxu3 %v2548_v61 }
 0x230   : > { %2108 = vmatpush.msrb.mxu2 %v2531_v51  ;;  %2067 = vmatpush.msrb.mxu0 %v2500_v60 }
 0x231   : > { %2087 = vmatpush.msrb.mxu1 %v2516_v33  ;;  %2128 = vmatpush.msrb.mxu3 %v2547_v50 }
 0x232   : > { %2109 = vmatpush.msrb.mxu2 %v2530_v29  ;;  %2068 = vmatpush.msrb.mxu0 %v2499_v8 }
 0x233   : > { %2088 = vmatpush.msrb.mxu1 %v2515_v48  ;;  %2129 = vmatpush.msrb.mxu3 %v2546_v47 }
 0x234   : > { %2110 = vmatpush.msrb.mxu2 %v2529_v36  ;;  %2069 = vmatpush.msrb.mxu0 %v2498_v35 }
 0x235   : > { %2089 = vmatpush.msrb.mxu1 %v2514_v57  ;;  %2130 = vmatpush.msrb.mxu3 %v2545_v6 }
 0x236   : > { %2111 = vmatpush.msrb.mxu2 %v2528_v21  ;;  %2070 = vmatpush.msrb.mxu0 %v2497_v56 }
 0x237   : > { %1959 = vmatmul.f32.vlgmr.msra.gmra.mxu2 %v1896_v18  ;;  %2090 = vmatpush.msrb.mxu1 %v2513_v49 }
 0x238   : > { %2112 = vmatpush.msrb.mxu2 %v2527_v59  ;;  %2131 = vmatpush.msrb.mxu3 %v2544_v45 }
 0x239   : > { %1979 = vmatmul.f32.vlgmr.msra.gmra.mxu3 %v1898_v17  ;;  %2071 = vmatpush.msrb.mxu0 %v2496_v15 }
 0x23a   : > { %2091 = vmatpush.msrb.mxu1 %v2512_v55  ;;  %2113 = vmatpush.msrb.mxu2 %v2526_v53 }
 0x23b   : > { %2132 = vmatpush.msrb.mxu3 %v2543_v20  ;;  %1919 = vmatmul.f32.vlgmr.msra.gmra.mxu0 %v1892_v63 }
 0x23c   : > { %1939 = vmatmul.f32.vlgmr.msra.gmra.mxu1 %v1894_v12  ;;  %2072 = vmatpush.msrb.mxu0 %v2495_v31 }
 0x23d   : > { %2092 = vmatpush.msrb.mxu1 %v2511_v38  ;;  %2114 = vmatpush.msrb.mxu2 %v2525_v23 }
 0x23e   : > { %2133 = vmatpush.msrb.mxu3 %v2542_v46  ;;  %2073 = vmatpush.msrb.mxu0 %v2494_v40 }
 0x23f   : > { %2093 = vmatpush.msrb.mxu1 %v2510_v43  ;;  %2115 = vmatpush.msrb.mxu2 %v2524_v26 }
 0x240   : > { %2134 = vmatpush.msrb.mxu3 %v2541_v34  ;;  %2116 = vmatmul.f32.vlgmr.msrb.gmra.mxu2 %v2053_v7 }
 0x241   : > { %2074 = vmatpush.msrb.mxu0 %v2493_v24  ;;  %2094 = vmatpush.msrb.mxu1 %v2509_v30 }
 0x242   : > { %2135 = vmatpush.msrb.mxu3 %v2540_v3 }
 0x243   : > { %2136 = vmatmul.f32.vlgmr.msrb.gmra.mxu3 %v2055_v25  ;;  %2075 = vmatpush.msrb.mxu0 %v2492_v0 }
 0x244   : > { %2095 = vmatpush.msrb.mxu1 %v2508_v32  ;;  %2076 = vmatmul.f32.vlgmr.msrb.gmra.mxu0 %v2049_v13 }
 0x245   : > { %2096 = vmatmul.f32.vlgmr.msrb.gmra.mxu1 %v2051_v9 }
 0x2b8   : > { %v1920_v1 = vpop.f32.mrf.mxu0 }
 0x2b9   : > { %v1940_v10 = vpop.f32.mrf.mxu1 }
 0x2ba   : > { %v1960_v5 = vpop.f32.mrf.mxu2  ;;  %v1941_v19 = vadd.f32 %v1940_v10, %v1920_v1 }
 0x2bc   : > { %v1980_v58 = vpop.f32.mrf.mxu3  ;;  %v1961_v2 = vadd.f32 %v1960_v5, %v1941_v19 }
 0x2be   : > { %v1981_v14 = vadd.f32 %v1980_v58, %v1961_v2 }
 0x2c1   : > { %v2077_v22 = vpop.f32.mrf.mxu0 }
 0x2c2   : > { %v2097_v37 = vpop.f32.mrf.mxu1 }
 0x2c3   : > { %v2098_v52 = vadd.f32 %v2097_v37, %v2077_v22  ;;  %v2117_v42 = vpop.f32.mrf.mxu2 }
 0x2c5   : > { %v2118_v61 = vadd.f32 %v2117_v42, %v2098_v52 }
 0x2c6   : > { %v2137_v51 = vpop.f32.mrf.mxu3 }
 0x2c7   : > { %v2138_v60 = vadd.f32 %v2137_v51, %v2118_v61 }
 0x2c9   : > { %v2142_v33 = vrot.slane %v2138_v60, 6 }
 0x2cb   : > { %v2143_v50 = vsel %vm1303_vm0, %v1981_v14, %v2142_v33 }
 0x2cc   : > { %2145 = vst [vmem:[%s3823_s20] sm:$0xf] %v2143_v50 }
 0x2cd PF: > { %s2569_s12 = sshll.u32 %s2961_s25, 5  ;;  %s2185_s17 = sshll.u32 %s3814_s10, 4  ;;  %s2186_s17 = int_to_ptr.vmem [resolvable:$true] %s2185_s17 }
 0x2ce   : > { %s2183_s16 = scalar_lea.hbm %s4211_s5, %s2569_s12  ;;  %s4142_s27 = scalar_lea.sflag [#allocation12], %s328_s11 }
 0x2cf   : > { %s2187_s0 = sshll.u32 %s2183_s16, 4  ;;  %s2786_s18 = scalar_lea.hbm %s4211_s5, 64  ;;  %s2188_s0 = int_to_ptr.hbm [resolvable:$true] %s2187_s0 }
 0x2d0   : > { %s2780_s19 = sshra.s32 %s2188_s0, 4  ;;  %s2781_s19 = int_to_ptr.hbm [resolvable:$true] %s2780_s19 }
 0x2d1   : > { %s2782_s15 = scalar_lea.hbm %s2781_s19, 32  ;;  %p2787_p7 = scmp.lt.s32.totalorder %s2781_s19, %s4211_s5 }
 0x2d2   : > { %p2783_p3 = scmp.ne.s32.totalorder %s2781_s19, %s2782_s15  ;;  %p2788_p8 = scmp.lt.s32.totalorder %s2786_s18, %s2782_s15 }
 0x2d4   : > { %p2784_p4 = pnand %p2783_p3, %p2988_p11  ;;  %p2789_p10 = por %p2788_p8, %p2787_p7 }
 0x2d6   : > { %p2785_p5 = pneg %p2784_p4 }
 0x2d8   : > { %p2790_p0 = pnand %p2789_p10, %p2785_p5 }
 0x2da   : > { %2793 = shalt.err (!%p2790_p0)
}
 0x2db   : > { %2581 = dma.vmem_to_hbm [thread:$0]  (%p2988_p11), %s2186_s17, 512, %s2188_s0, %s4142_s27  }
 0x2dc   : > { %s2168_s13 = scalar_lea.hbm %s4210_s4, %s2569_s12  ;;  %s2170_s10 = sshll.u32 %s3734_s26, 4  ;;  %s2171_s10 = int_to_ptr.vmem [resolvable:$true] %s2170_s10 }
 0x2dd   : > { %s2172_s1 = sshll.u32 %s2168_s13, 4  ;;  %s2571_s29 = sshll.u32 %s2961_s25, 2  ;;  %s2173_s1 = int_to_ptr.hbm [resolvable:$true] %s2172_s1 }
 0x2de   : > { %s2147_s16 = scalar_lea.sflag [#allocation4], %s3093_s30  ;;  %s2808_s19 = sshra.s32 %s2173_s1, 4  ;;  %s2809_s19 = int_to_ptr.hbm [resolvable:$true] %s2808_s19 }
 0x2df   : > { %s2810_s15 = scalar_lea.hbm %s2809_s19, 32  ;;  %s2814_s17 = scalar_lea.hbm %s4210_s4, 64 }
 0x2e0   : > { %p2811_p6 = scmp.ne.s32.totalorder %s2809_s19, %s2810_s15  ;;  %p2815_p2 = scmp.lt.s32.totalorder %s2809_s19, %s4210_s4 }
 0x2e1   : > { %p2816_p3 = scmp.lt.s32.totalorder %s2814_s17, %s2810_s15 }
 0x2e2   : > { %p2812_p13 = pnand %p2811_p6, %p2988_p11 }
 0x2e3   : > { %p2817_p4 = por %p2816_p3, %p2815_p2 }
 0x2e4   : > { %p2813_p1 = pneg %p2812_p13 }
 0x2e6   : > { %p2818_p5 = pnand %p2817_p4, %p2813_p1 }
 0x2e8   : > { %2821 = shalt.err (!%p2818_p5)
}
 0x2e9   : > { %2580 = dma.vmem_to_hbm [thread:$0]  (%p2988_p11), %s2171_s10, 512, %s2173_s1, %s2147_s16  }
 0x2ea   : > { %s2198_s26 = scalar_lea.hbm %s4212_s6, %s2571_s29  ;;  %s2200_s12 = sshll.u32 %s3823_s20, 4  ;;  %s2201_s12 = int_to_ptr.vmem [resolvable:$true] %s2200_s12 }
 0x2eb   : > { %s2202_s28 = sshll.u32 %s2198_s26, 4  ;;  %s2842_s19 = scalar_lea.hbm %s4212_s6, 8  ;;  %s2203_s28 = int_to_ptr.hbm [resolvable:$true] %s2202_s28 }
 0x2ec   : > { %s2836_s14 = sshra.s32 %s2203_s28, 4  ;;  %s2837_s14 = int_to_ptr.hbm [resolvable:$true] %s2836_s14 }
 0x2ed   : > { %s2838_s11 = scalar_lea.hbm %s2837_s14, 4  ;;  %p2843_p0 = scmp.lt.s32.totalorder %s2837_s14, %s4212_s6 }
 0x2ee   : > { %p2839_p7 = scmp.ne.s32.totalorder %s2837_s14, %s2838_s11  ;;  %p2844_p6 = scmp.lt.s32.totalorder %s2842_s19, %s2838_s11 }
 0x2f0   : > { %p2840_p8 = pnand %p2839_p7, %p2988_p11  ;;  %p2845_p13 = por %p2844_p6, %p2843_p0 }
 0x2f2   : > { %p2841_p10 = pneg %p2840_p8 }
 0x2f4   : > { %p2846_p1 = pnand %p2845_p13, %p2841_p10 }
 0x2f6   : > { %2849 = shalt.err (!%p2846_p1)
}
 0x2f7   : > { %2582 = dma.vmem_to_hbm [thread:$0]  (%p2988_p11), %s2201_s12, 64, %s2203_s28, %s4142_s27  }
 0x2f8 PF: > { %s2214_s29 = sand.u32 1, %s2888_s21   ;;  %p2600_p2 = pnand %p2404_p9, %p2992_p12 }
 0x2f9   : > { %s2215_s16 = scalar_lea.sflag [#allocation4], %s2214_s29 }
 0x2fa   : > { %p2601_p3 = pneg %p2600_p2 }
 0x2fc   : > { %2879 = dma.done.wait (%p2601_p3), %s2215_s16, 512  }
 0x2fd   : > { %2881 = vsyncadd (%p2601_p3), %s2215_s16, 4294966784  ;;  %s4337_s15 = sadd.s32 4294967294, %s2900_s24  }
 0x2fe   : > { %s2224_s23 = sand.u32 1, %s4337_s15  }
 0x2ff   : > { %s2225_s7 = scalar_lea.sflag [#allocation12], %s2224_s23 }
 0x300   : > { %2883 = dma.done.wait (%p2601_p3), %s2225_s7, 576  }
 0x301   : > { %2885 = vsyncadd (%p2601_p3), %s2225_s7, 4294966720  ;;  %s4338_s24 = sld [smem:[#allocation20_spill]]  ;;  %s4341_s21 = smov %s2892_s22 }
 0x302   : > { %s4339_s8 = sld [smem:[#allocation19_spill]] }
 0x303   : > { %s4340_s23 = sld [smem:[#allocation21_spill]] }
 0x307   : > { %p29_p11 = scmp.ge.s32.totalorder %s4338_s24, 4  }
 0x308   : > { %s4342_s22 = smov %s4339_s8 }
 0x309   :  { %31 = sbr.rel (!%p29_p11) target bundleno = 14 (0xe), region = 160 }
 0x30e   :  { %2241 = vsyncpa [#allocation3], 1 }
 0x30f   :  { %2243 = vsyncpa [#allocation3 + $0x1], 1 }
 0x310   :  { %2244 = vsyncpa [#allocation6], 1 }
 0x311   :  { %2246 = vsyncpa [#allocation6 + $0x1], 1 }
 0x312   :  { %2247 = vsyncpa [#allocation9], 1 }
 0x313   :  { %2249 = vsyncpa [#allocation9 + $0x1], 1 }
 0x314   :  { %2250 = vsyncpa [#allocation4], 1 }
 0x315   :  { %2252 = vsyncpa [#allocation4 + $0x1], 1 }
 0x316   :  { %2253 = vsyncpa [#allocation12], 1 }
 0x317   :  { %2255 = vsyncpa [#allocation12 + $0x1], 1 }

</bundles_post_ra>
